<compile_context>
chip_gen: v6e
topology: v6e:2x2x1
jax: 0.10.0
libtpu: 0.0.40
codegen_flags: <defaults>
</compile_context>

<pallas_src>
import functools
import math

import jax
import jax.numpy as jnp
from jax import lax
from jax.experimental import pallas as pl
from jax.experimental.pallas import tpu as pltpu


# ----------------------------- fused Pallas kernel ---------------------------

def _csk_measure(q, ki, vi, ke, ve, mi_row, me_row, mi_col, me_col,
                 pair_zero, eye, inv_sqrt_d):
    """CSK_Measure attention for one (head, type) pair, fully in-register."""
    f32 = jnp.float32
    si = lax.dot_general(q, ki, (((1,), (1,)), ((), ())),
                         preferred_element_type=f32) * inv_sqrt_d      # (1, N)
    se = lax.dot_general(q, ke, (((1,), (1,)), ((), ())),
                         preferred_element_type=f32) * inv_sqrt_d      # (1, N)
    s = jnp.where(pair_zero, -1e9, si * mi_row + se * me_row)
    s = s - jnp.max(s, axis=-1, keepdims=True)
    p = jnp.exp(s)
    p = p * pl.reciprocal(jnp.sum(p, axis=-1, keepdims=True), approx=True)
    # lane-row -> sublane-column "transpose" via the identity matrix (VPU+XLU);
    # mask columns are precomputed, so only one reduce per call.
    p_col = jnp.sum(eye * p, axis=-1, keepdims=True)                   # (N, 1)
    ci_col = p_col * mi_col
    ce_col = p_col * me_col
    target_enhanced = (ci_col + ce_col) * q                            # (N, H)
    csk_enhanced = ci_col * vi + ce_col * ve                           # (N, H)
    return target_enhanced + csk_enhanced, p


def _kbcin_kernel(conv_ref,
                  x2_ref, emo_ref, csk_stack_ref, intra_ref, inter_ref,
                  umask_ref,
                  csk_w_ref, csk_b_ref, W_heads_ref, a1_ref, a2_ref,
                  evw_ref, evb_ref, qw_ref, qb_ref, ww_ref, wb_ref,
                  kvw_ref, kvb_ref, mlp_w1_ref, mlp_w2_ref, predw_ref,
                  logits_ref, probs_ref,
                  *, N, H, n_heads, alpha, inv_sqrt_d):
    f32 = jnp.float32
    x2 = x2_ref[...]                                # (N, H)
    emo = emo_ref[...]                              # (N, H)
    intra = intra_ref[...]                          # (N, N)
    inter = inter_ref[...]                          # (N, N)

    # target row (conv_len - 1), selected with a one-hot matmul (scalar prefetch
    # keeps conv_len on-device; no dynamic-slice relayout needed).
    t = conv_ref[0] - 1
    onehot = (lax.broadcasted_iota(jnp.int32, (1, N), 1) == t).astype(f32)
    target_vec = jnp.dot(onehot, x2, preferred_element_type=f32)       # (1, H)
    target_emo = jnp.dot(onehot, emo, preferred_element_type=f32)      # (1, H)
    mi_row = jnp.dot(onehot, intra, preferred_element_type=f32)        # (1, N)
    me_row = jnp.dot(onehot, inter, preferred_element_type=f32)        # (1, N)

    eye = (lax.broadcasted_iota(jnp.int32, (N, N), 0) ==
           lax.broadcasted_iota(jnp.int32, (N, N), 1)).astype(f32)

    # per-forward constants shared by all four CSK_Measure calls (hoisted).
    mi_col = jnp.sum(eye * mi_row, axis=-1, keepdims=True)             # (N, 1)
    me_col = jnp.sum(eye * me_row, axis=-1, keepdims=True)             # (N, 1)
    pair_zero = (mi_row + me_row) == 0.0                               # (1, N)

    adj = intra + inter
    adj_zero = adj == 0.0                                              # (N, N)

    # shared csk_lin: the six (N, CSK) projections batched in ONE matmul.
    csk_all = jnp.dot(csk_stack_ref[...], csk_w_ref[...],
                      preferred_element_type=f32) + csk_b_ref[...]
    csk_all = jnp.maximum(csk_all, 0.0)                                # ReLU
    csk4 = csk_all[0:4 * N, :]        # [emo_intra; emo_inter; act_intra; act_inter]
    ev_pair = csk_all[4 * N:6 * N, :]  # [event_before; event_after]

    # head-independent packed projections (wide, lane-dense matmuls).
    h_all = jnp.dot(x2, W_heads_ref[...], preferred_element_type=f32)  # (N, nH*H)
    ev_all = jnp.dot(ev_pair, evw_ref[...],
                     preferred_element_type=f32) + evb_ref[...]        # (2N, nH*H)
    q_emo_all = jnp.dot(target_vec + target_emo, qw_ref[...],
                        preferred_element_type=f32) + qb_ref[...]      # (1, 2*nH*H)
    q_act_all = jnp.dot(target_vec, qw_ref[...],
                        preferred_element_type=f32) + qb_ref[...]      # (1, 2*nH*H)
    w_all = jnp.dot(csk4, ww_ref[...],
                    preferred_element_type=f32) + wb_ref[...]          # (4N, 2*nH*H)

    a1 = a1_ref[...]
    a2 = a2_ref[...]
    kvw = kvw_ref[...]
    kvb = kvb_ref[...]

    head_outs = []
    for h in range(n_heads):
        c0 = h * H
        h_h = h_all[:, c0:c0 + H]                                       # (N, H)
        bf_p = ev_all[0:N, c0:c0 + H]
        af_p = ev_all[N:2 * N, c0:c0 + H]
        hj = h_h + af_p + bf_p

        # graph attention (Interaction): e[i,j] = lrelu(h[i].a1 + hj[j].a2)
        s1 = lax.dot_general(h_h, a1[h:h + 1, :], (((1,), (1,)), ((), ())),
                             preferred_element_type=f32)                # (N, 1)
        s2 = lax.dot_general(a2[h:h + 1, :], hj, (((1,), (1,)), ((), ())),
                             preferred_element_type=f32)                # (1, N)
        e = s1 + s2
        e = jnp.where(e >= 0.0, e, alpha * e)                           # LeakyReLU
        e = e * intra + e * inter
        scores = jnp.where(adj_zero, -1e9, e)
        scores = scores - jnp.max(scores, axis=-1, keepdims=True)
        p = jnp.exp(scores)
        attn = p * pl.reciprocal(jnp.sum(p, axis=-1, keepdims=True),
                                 approx=True)
        h_prime = jnp.dot(attn, h_h, preferred_element_type=f32)        # (N, H)

        # fused K/V projections of BOTH CSK_Measure modules of this head:
        # (N, H) x (H, 4H=128) -> full-width lane-dense output.
        kv = jnp.dot(h_prime, kvw[c0:c0 + H, :],
                     preferred_element_type=f32) + kvb[h:h + 1, :]      # (N, 4H)
        kh_emo, vh_emo = kv[:, 0:H], kv[:, H:2 * H]
        kh_act, vh_act = kv[:, 2 * H:3 * H], kv[:, 3 * H:4 * H]

        we0 = 2 * h * H            # emo column block of the per-head packs
        wa0 = (2 * h + 1) * H      # act column block
        wi_emo = w_all[0:N, we0:we0 + H]
        we_emo = w_all[N:2 * N, we0:we0 + H]
        wi_act = w_all[2 * N:3 * N, wa0:wa0 + H]
        we_act = w_all[3 * N:4 * N, wa0:wa0 + H]

        q_emo = q_emo_all[:, we0:we0 + H]
        q_act = q_act_all[:, wa0:wa0 + H]

        ff_emo, p_emo = _csk_measure(q_emo,
                                     kh_emo + wi_emo, vh_emo + wi_emo,
                                     kh_emo + we_emo, vh_emo + we_emo,
                                     mi_row, me_row, mi_col, me_col,
                                     pair_zero, eye, inv_sqrt_d)
        ff_act, p_act = _csk_measure(q_act,
                                     kh_act + wi_act, vh_act + wi_act,
                                     kh_act + we_act, vh_act + we_act,
                                     mi_row, me_row, mi_col, me_col,
                                     pair_zero, eye, inv_sqrt_d)

        head_outs.append(jnp.maximum(h_prime + x2 + ff_emo + ff_act, 0.0))
        probs_ref[2 * h:2 * h + 1, :] = p_emo
        probs_ref[2 * h + 1:2 * h + 2, :] = p_act

    # CausePredictor (bias-free MLP + sigmoid; dropout = identity).
    # concat([x2, head0, head1]) @ W1 realised as a sum of per-block matmuls
    # (no in-kernel concatenation needed).
    parts = [x2] + head_outs
    z1 = jnp.dot(parts[0], mlp_w1_ref[0:H, :], preferred_element_type=f32)
    for i in range(1, len(parts)):
        z1 = z1 + jnp.dot(parts[i], mlp_w1_ref[i * H:(i + 1) * H, :],
                          preferred_element_type=f32)
    z1 = jnp.maximum(z1, 0.0)
    z2 = jnp.maximum(jnp.dot(z1, mlp_w2_ref[...], preferred_element_type=f32),
                     0.0)
    score = lax.dot_general(predw_ref[...], z2, (((1,), (1,)), ((), ())),
                            preferred_element_type=f32)                 # (1, N)
    logits_ref[...] = jax.nn.sigmoid(score) * umask_ref[...]


def _fused_call(conv_len, ins, N, H, n_heads, alpha):
    in_specs = [pl.BlockSpec(a.shape, lambda i, c: (0, 0)) for a in ins]
    out_shape = (jax.ShapeDtypeStruct((1, N), jnp.float32),
                 jax.ShapeDtypeStruct((2 * n_heads, N), jnp.float32))
    out_specs = [pl.BlockSpec((1, N), lambda i, c: (0, 0)),
                 pl.BlockSpec((2 * n_heads, N), lambda i, c: (0, 0))]
    grid_spec = pltpu.PrefetchScalarGridSpec(
        num_scalar_prefetch=1, grid=(1,),
        in_specs=in_specs, out_specs=out_specs)
    kernel = functools.partial(_kbcin_kernel, N=N, H=H, n_heads=n_heads,
                               alpha=alpha, inv_sqrt_d=1.0 / math.sqrt(H))
    return pl.pallas_call(
        kernel,
        out_shape=out_shape,
        grid_spec=grid_spec,
        compiler_params=pltpu.CompilerParams(
            dimension_semantics=("arbitrary",)),
        cost_estimate=pl.CostEstimate(flops=1_500_000, transcendentals=512,
                                      bytes_accessed=200_000),
    )(conv_len, *ins)


# ------------------------------ model wrapper --------------------------------

@jax.jit
def kbcin_forward(packed, utter_emb, relative_position, emotion_label,
                  intra_mask, inter_mask, bf, af, xW, xR, oW, oR, umask):
    """Full KBCIN forward (eval mode). `utter_emb` replaces the RoBERTa encoder."""
    N = utter_emb.shape[1]
    H = packed["W_heads"].shape[0]
    n_heads = packed["a1"].shape[0]

    pos_emb = packed["pos_table"][relative_position]              # (1, N, H)
    emo_emb = packed["emo_table"][emotion_label]                  # (1, N, H)
    x2 = (utter_emb + pos_emb + emo_emb)[0].astype(jnp.float32)   # (N, H)
    emo2d = emo_emb[0].astype(jnp.float32)

    # scalar-prefetch conv_len: stays on device, no host sync, no recompiles.
    conv_len = jnp.sum(umask != 0, axis=-1).astype(jnp.int32)     # (1,)

    # six csk_lin inputs batched into a single (6N, CSK) operand
    csk_stack = jnp.concatenate(
        [xR[0], oR[0], xW[0], oW[0], bf[0], af[0]], axis=0).astype(jnp.float32)

    intra2d = intra_mask.astype(jnp.float32)                      # (N, N)
    inter2d = inter_mask[0].astype(jnp.float32)                   # (N, N)
    umask_row = umask.astype(jnp.float32)                         # (1, N)

    ins = (x2, emo2d, csk_stack, intra2d, inter2d, umask_row,
           packed["csk_w"], packed["csk_b"], packed["W_heads"],
           packed["a1"], packed["a2"], packed["evw"], packed["evb"],
           packed["qw"], packed["qb"], packed["ww"], packed["wb"],
           packed["kvw"], packed["kvb"],
           packed["mlp_w1"], packed["mlp_w2"], packed["pred_w_row"])
    logits, probs = _fused_call(conv_len, ins, N, H, n_heads, alpha=0.01)

    e_atts = [probs[2 * h:2 * h + 1][None] for h in range(n_heads)]   # (1, 1, N)
    a_atts = [probs[2 * h + 1:2 * h + 2][None] for h in range(n_heads)]
    return logits, e_atts, a_atts


# ------------------------------- parameters ----------------------------------

def init_params(key, H, csk_dim, emotion_num, n_heads=2):
    """'Natural' (PyTorch-like) parameter structure."""
    keys = iter(jax.random.split(key, 128))

    def nrm(shape, scale=0.1):
        return jax.random.normal(next(keys), shape, jnp.float32) * scale

    def lin(i, o):
        return nrm((i, o)), nrm((o,), 0.01)

    def csk_measure_params():
        qw, qb = lin(H, H)
        kw, kb = lin(H, H)
        vw, vb = lin(H, H)
        ww, wb = lin(H, H)
        return dict(q_w=qw, q_b=qb, k_w=kw, k_b=kb,
                    v_w=vw, v_b=vb, w_w=ww, w_b=wb)

    heads = []
    for _ in range(n_heads):
        a = nrm((2 * H, 1))
        cw, cb = lin(H, H)
        heads.append(dict(W=nrm((H, H)),
                          a1=a[:H].reshape(1, H), a2=a[H:].reshape(1, H),
                          csk_w=cw, csk_b=cb,
                          emo=csk_measure_params(), act=csk_measure_params()))

    pos_table = jax.random.uniform(next(keys), (32, H), jnp.float32, -0.1, 0.1)
    emo_table = nrm((emotion_num, H)).at[0].set(0.0)   # padding_idx = 0
    csk_w, csk_b = lin(csk_dim, H)
    mlp_w1 = nrm((3 * H, 3 * H))
    mlp_w2 = nrm((3 * H, 3 * H))
    pred_w = nrm((3 * H, 1))
    return dict(heads=heads, pos_table=pos_table, emo_table=emo_table,
                csk_w=csk_w, csk_b=csk_b,
                mlp_w1=mlp_w1, mlp_w2=mlp_w2, pred_w=pred_w)


def pack_params(p, n_heads, H):
    """One-time host-side packing of weights into wide, VMEM-resident slabs."""
    f32 = jnp.float32
    heads = p["heads"]

    def row(b):
        return jnp.reshape(b, (1, -1)).astype(f32)

    W_heads = jnp.concatenate([h["W"] for h in heads], axis=1).astype(f32)
    a1 = jnp.concatenate([h["a1"] for h in heads], axis=0).astype(f32)
    a2 = jnp.concatenate([h["a2"] for h in heads], axis=0).astype(f32)
    evw = jnp.concatenate([h["csk_w"] for h in heads], axis=1).astype(f32)
    evb = jnp.concatenate([row(h["csk_b"]) for h in heads], axis=1)
    qw = jnp.concatenate(
        [jnp.concatenate([h["emo"]["q_w"], h["act"]["q_w"]], axis=1)
         for h in heads], axis=1).astype(f32)                       # (H, 2*nH*H)
    qb = jnp.concatenate(
        [jnp.concatenate([row(h["emo"]["q_b"]), row(h["act"]["q_b"])], axis=1)
         for h in heads], axis=1)
    ww = jnp.concatenate(
        [jnp.concatenate([h["emo"]["w_w"], h["act"]["w_w"]], axis=1)
         for h in heads], axis=1).astype(f32)                       # (H, 2*nH*H)
    wb = jnp.concatenate(
        [jnp.concatenate([row(h["emo"]["w_b"]), row(h["act"]["w_b"])], axis=1)
         for h in heads], axis=1)
    kvw = jnp.concatenate(
        [jnp.concatenate([h["emo"]["k_w"], h["emo"]["v_w"],
                          h["act"]["k_w"], h["act"]["v_w"]], axis=1)
         for h in heads], axis=0).astype(f32)                       # (nH*H, 4H)
    kvb = jnp.concatenate(
        [jnp.concatenate([row(h["emo"]["k_b"]), row(h["emo"]["v_b"]),
                          row(h["act"]["k_b"]), row(h["act"]["v_b"])], axis=1)
         for h in heads], axis=0)                                   # (nH, 4H)
    return dict(pos_table=p["pos_table"].astype(f32),
                emo_table=p["emo_table"].astype(f32),
                csk_w=p["csk_w"].astype(f32), csk_b=row(p["csk_b"]),
                W_heads=W_heads, a1=a1, a2=a2, evw=evw, evb=evb,
                qw=qw, qb=qb, ww=ww, wb=wb, kvw=kvw, kvb=kvb,
                mlp_w1=p["mlp_w1"].astype(f32), mlp_w2=p["mlp_w2"].astype(f32),
                pred_w_row=jnp.reshape(p["pred_w"], (1, -1)).astype(f32))


# ------------------------- pure-JAX reference (unfused) ----------------------

def reference_forward(params, utter_emb, relative_position, emotion_label,
                      intra_mask, inter_mask, bf, af, xW, xR, oW, oR, umask,
                      alpha=0.01):
    H = params["csk_w"].shape[1]
    pos = params["pos_table"][relative_position]
    emo = params["emo_table"][emotion_label]
    x2 = (utter_emb + pos + emo)[0]
    emo2d = emo[0]

    def lin(v, w, b=None):
        y = v @ w
        return y if b is None else y + b

    def csk_lin(v):
        return jax.nn.relu(lin(v[0], params["csk_w"], params["csk_b"]))

    emo_intra, emo_inter = csk_lin(xR), csk_lin(oR)
    act_intra, act_inter = csk_lin(xW), csk_lin(oW)
    ev_bf, ev_af = csk_lin(bf), csk_lin(af)

    intra2d = intra_mask.astype(jnp.float32)
    inter2d = inter_mask[0].astype(jnp.float32)
    t = int(jnp.sum(umask != 0)) - 1
    mi, me = intra2d[t:t + 1], inter2d[t:t + 1]
    tv, te = x2[t:t + 1], emo2d[t:t + 1]

    def csk_measure(pm, q_in, hidden, intra_csk, inter_csk):
        q = lin(q_in, pm["q_w"], pm["q_b"])
        kh = lin(hidden, pm["k_w"], pm["k_b"])
        vh = lin(hidden, pm["v_w"], pm["v_b"])
        wi = lin(intra_csk, pm["w_w"], pm["w_b"])
        we = lin(inter_csk, pm["w_w"], pm["w_b"])
        ki, vi, ke, ve = kh + wi, vh + wi, kh + we, vh + we
        si = (q @ ki.T) / math.sqrt(H) * mi
        se = (q @ ke.T) / math.sqrt(H) * me
        s = jnp.where((mi + me) == 0.0, -1e9, si + se)
        p = jax.nn.softmax(s, axis=-1)
        ci, ce = (p * mi).T, (p * me).T
        return (ci + ce) * q + ci * vi + ce * ve, p

    head_outs, e_atts, a_atts = [], [], []
    for hp in params["heads"]:
        h = x2 @ hp["W"]
        bf_p = lin(ev_bf, hp["csk_w"], hp["csk_b"])
        af_p = lin(ev_af, hp["csk_w"], hp["csk_b"])
        hj = h + af_p + bf_p
        e = (h @ hp["a1"].T) + (hj @ hp["a2"].T).T
        e = jnp.where(e >= 0.0, e, alpha * e)
        e = e * intra2d + e * inter2d
        adj = intra2d + inter2d
        attn = jax.nn.softmax(jnp.where(adj == 0.0, -1e9, e), axis=-1)
        h_prime = attn @ h
        ff_e, p_e = csk_measure(hp["emo"], tv + te, h_prime, emo_intra, emo_inter)
        ff_a, p_a = csk_measure(hp["act"], tv, h_prime, act_intra, act_inter)
        head_outs.append(jax.nn.relu(h_prime + x2 + ff_e + ff_a))
        e_atts.append(p_e)
        a_atts.append(p_a)

    final = jnp.concatenate([x2] + head_outs, axis=1)
    z = jax.nn.relu(final @ params["mlp_w1"])
    z = jax.nn.relu(z @ params["mlp_w2"])
    score = jax.nn.sigmoid((z @ params["pred_w"]).reshape(1, -1))
    return score * umask.astype(jnp.float32), e_atts, a_atts


# ---------------------------------- main -------------------------------------

if __name__ == "__main__":
    key = jax.random.PRNGKey(0)
    B, N, H, CSK = 1, 8, 32, 16      # batch, seq_len, hidden_dim, csk_dim
    emotion_num = 7
    n_heads = 2

    ks = jax.random.split(key, 16)
    params = init_params(ks[0], H, CSK, emotion_num, n_heads=n_heads)
    packed = pack_params(params, n_heads, H)

    utter_emb = jax.random.normal(ks[1], (B, N, H), jnp.float32)
    relative_position = jax.random.randint(ks[2], (B, N), 0, 31)
    emotion_label = jax.random.randint(ks[3], (B, N), 1, emotion_num)

    # speaker-aware lower-triangular masks (intra = same speaker, inter = other)
    tri = jnp.tril(jnp.ones((N, N), jnp.float32))
    spk = jnp.arange(N) % 2
    same = (spk[:, None] == spk[None, :]).astype(jnp.float32)
    intra_mask = tri * same                    # (N, N)  (KBCIN unsqueezes this)
    inter_mask = (tri * (1.0 - same))[None]    # (1, N, N)

    bf, af, xW, xR, oW, oR = [jax.random.normal(k, (B, N, CSK), jnp.float32)
                              for k in jax.random.split(ks[4], 6)]
    umask = jnp.array([[1.0] * 6 + [0.0] * 2], jnp.float32)   # (B, N)

    logits, e_att, a_att = kbcin_forward(
        packed, utter_emb, relative_position, emotion_label,
        intra_mask, inter_mask, bf, af, xW, xR, oW, oR, umask)
    jax.block_until_ready(logits)

    assert logits.shape == (B, N)
    assert e_att[0].shape == (1, 1, N) and a_att[0].shape == (1, 1, N)

    # correctness check against an unfused pure-JAX reference of the same math
    with jax.default_matmul_precision("highest"):
        ref_logits, ref_e, ref_a = reference_forward(
            params, utter_emb, relative_position, emotion_label,
            intra_mask, inter_mask, bf, af, xW, xR, oW, oR, umask)
    assert jnp.allclose(logits, ref_logits, atol=2e-2, rtol=2e-2)
    for h in range(n_heads):
        assert jnp.allclose(e_att[h][0], ref_e[h], atol=2e-2, rtol=2e-2)
        assert jnp.allclose(a_att[h][0], ref_a[h], atol=2e-2, rtol=2e-2)

    print("KERNEL_OK")
</pallas_src>

<mosaic_0001>
module attributes {stable_mosaic.version = 11 : i64} {
  func.func @_kbcin_kernel(%arg0: i32, %arg1: memref<1xi32, #tpu.memory_space<smem>>, %arg2: memref<8x32xf32, #tpu.memory_space<vmem>>, %arg3: memref<8x32xf32, #tpu.memory_space<vmem>>, %arg4: memref<48x16xf32, #tpu.memory_space<vmem>>, %arg5: memref<8x8xf32, #tpu.memory_space<vmem>>, %arg6: memref<8x8xf32, #tpu.memory_space<vmem>>, %arg7: memref<1x8xf32, #tpu.memory_space<vmem>>, %arg8: memref<16x32xf32, #tpu.memory_space<vmem>>, %arg9: memref<1x32xf32, #tpu.memory_space<vmem>>, %arg10: memref<32x64xf32, #tpu.memory_space<vmem>>, %arg11: memref<2x32xf32, #tpu.memory_space<vmem>>, %arg12: memref<2x32xf32, #tpu.memory_space<vmem>>, %arg13: memref<32x64xf32, #tpu.memory_space<vmem>>, %arg14: memref<1x64xf32, #tpu.memory_space<vmem>>, %arg15: memref<32x128xf32, #tpu.memory_space<vmem>>, %arg16: memref<1x128xf32, #tpu.memory_space<vmem>>, %arg17: memref<32x128xf32, #tpu.memory_space<vmem>>, %arg18: memref<1x128xf32, #tpu.memory_space<vmem>>, %arg19: memref<64x128xf32, #tpu.memory_space<vmem>>, %arg20: memref<2x128xf32, #tpu.memory_space<vmem>>, %arg21: memref<96x96xf32, #tpu.memory_space<vmem>>, %arg22: memref<96x96xf32, #tpu.memory_space<vmem>>, %arg23: memref<1x96xf32, #tpu.memory_space<vmem>>, %arg24: memref<1x8xf32, #tpu.memory_space<vmem>>, %arg25: memref<4x8xf32, #tpu.memory_space<vmem>>) attributes {dimension_semantics = [#tpu.dimension_semantics<arbitrary>], iteration_bounds = array<i64: 1>, scalar_prefetch = 1 : i64, scratch_operands = 0 : i64, tpu.core_type = #tpu.core_type<tc>, window_params = [{pipeline_mode = #tpu.pipeline_mode<synchronous>, transform_indices = @transform_0, window_bounds = array<i64: 8, 32>}, {pipeline_mode = #tpu.pipeline_mode<synchronous>, transform_indices = @transform_1, window_bounds = array<i64: 8, 32>}, {pipeline_mode = #tpu.pipeline_mode<synchronous>, transform_indices = @transform_2, window_bounds = array<i64: 48, 16>}, {pipeline_mode = #tpu.pipeline_mode<synchronous>, transform_indices = @transform_3, window_bounds = array<i64: 8, 8>}, {pipeline_mode = #tpu.pipeline_mode<synchronous>, transform_indices = @transform_4, window_bounds = array<i64: 8, 8>}, {pipeline_mode = #tpu.pipeline_mode<synchronous>, transform_indices = @transform_5, window_bounds = array<i64: 1, 8>}, {pipeline_mode = #tpu.pipeline_mode<synchronous>, transform_indices = @transform_6, window_bounds = array<i64: 16, 32>}, {pipeline_mode = #tpu.pipeline_mode<synchronous>, transform_indices = @transform_7, window_bounds = array<i64: 1, 32>}, {pipeline_mode = #tpu.pipeline_mode<synchronous>, transform_indices = @transform_8, window_bounds = array<i64: 32, 64>}, {pipeline_mode = #tpu.pipeline_mode<synchronous>, transform_indices = @transform_9, window_bounds = array<i64: 2, 32>}, {pipeline_mode = #tpu.pipeline_mode<synchronous>, transform_indices = @transform_10, window_bounds = array<i64: 2, 32>}, {pipeline_mode = #tpu.pipeline_mode<synchronous>, transform_indices = @transform_11, window_bounds = array<i64: 32, 64>}, {pipeline_mode = #tpu.pipeline_mode<synchronous>, transform_indices = @transform_12, window_bounds = array<i64: 1, 64>}, {pipeline_mode = #tpu.pipeline_mode<synchronous>, transform_indices = @transform_13, window_bounds = array<i64: 32, 128>}, {pipeline_mode = #tpu.pipeline_mode<synchronous>, transform_indices = @transform_14, window_bounds = array<i64: 1, 128>}, {pipeline_mode = #tpu.pipeline_mode<synchronous>, transform_indices = @transform_15, window_bounds = array<i64: 32, 128>}, {pipeline_mode = #tpu.pipeline_mode<synchronous>, transform_indices = @transform_16, window_bounds = array<i64: 1, 128>}, {pipeline_mode = #tpu.pipeline_mode<synchronous>, transform_indices = @transform_17, window_bounds = array<i64: 64, 128>}, {pipeline_mode = #tpu.pipeline_mode<synchronous>, transform_indices = @transform_18, window_bounds = array<i64: 2, 128>}, {pipeline_mode = #tpu.pipeline_mode<synchronous>, transform_indices = @transform_19, window_bounds = array<i64: 96, 96>}, {pipeline_mode = #tpu.pipeline_mode<synchronous>, transform_indices = @transform_20, window_bounds = array<i64: 96, 96>}, {pipeline_mode = #tpu.pipeline_mode<synchronous>, transform_indices = @transform_21, window_bounds = array<i64: 1, 96>}, {pipeline_mode = #tpu.pipeline_mode<synchronous>, transform_indices = @transform_22, window_bounds = array<i64: 1, 8>}, {pipeline_mode = #tpu.pipeline_mode<synchronous>, transform_indices = @transform_23, window_bounds = array<i64: 4, 8>}]} {
    %c0 = arith.constant 0 : index
    %c0_0 = arith.constant 0 : index
    %0 = vector.load %arg2[%c0, %c0_0] : memref<8x32xf32, #tpu.memory_space<vmem>>, vector<8x32xf32>
    %c0_1 = arith.constant 0 : index
    %c0_2 = arith.constant 0 : index
    %1 = vector.load %arg3[%c0_1, %c0_2] : memref<8x32xf32, #tpu.memory_space<vmem>>, vector<8x32xf32>
    %c0_3 = arith.constant 0 : index
    %c0_4 = arith.constant 0 : index
    %2 = vector.load %arg5[%c0_3, %c0_4] : memref<8x8xf32, #tpu.memory_space<vmem>>, vector<8x8xf32>
    %c0_5 = arith.constant 0 : index
    %c0_6 = arith.constant 0 : index
    %3 = vector.load %arg6[%c0_5, %c0_6] : memref<8x8xf32, #tpu.memory_space<vmem>>, vector<8x8xf32>
    %c0_7 = arith.constant 0 : index
    %4 = memref.load %arg1[%c0_7] : memref<1xi32, #tpu.memory_space<smem>>
    %c1_i32 = arith.constant 1 : i32
    %5 = arith.subi %4, %c1_i32 : i32
    %6 = tpu.iota {dimensions = array<i32: 1>} : vector<1x8xi32>
    %7 = vector.broadcast %5 : i32 to vector<1x8xi32>
    %8 = arith.cmpi eq, %6, %7 : vector<1x8xi32>
    %9 = arith.extui %8 : vector<1x8xi1> to vector<1x8xi32>
    %10 = arith.sitofp %9 : vector<1x8xi32> to vector<1x8xf32>
    %cst = arith.constant dense<0.000000e+00> : vector<1x32xf32>
    %11 = tpu.matmul %10, %0, %cst {dimension_numbers = #tpu.dot_dimension_numbers<[1], [0], [0], [1], [0, 0, 1, 1], [], []>} : vector<1x8xf32>, vector<8x32xf32>, vector<1x32xf32> -> vector<1x32xf32>
    %cst_8 = arith.constant dense<0.000000e+00> : vector<1x32xf32>
    %12 = tpu.matmul %10, %1, %cst_8 {dimension_numbers = #tpu.dot_dimension_numbers<[1], [0], [0], [1], [0, 0, 1, 1], [], []>} : vector<1x8xf32>, vector<8x32xf32>, vector<1x32xf32> -> vector<1x32xf32>
    %cst_9 = arith.constant dense<0.000000e+00> : vector<1x8xf32>
    %13 = tpu.matmul %10, %2, %cst_9 {dimension_numbers = #tpu.dot_dimension_numbers<[1], [0], [0], [1], [0, 0, 1, 1], [], []>} : vector<1x8xf32>, vector<8x8xf32>, vector<1x8xf32> -> vector<1x8xf32>
    %cst_10 = arith.constant dense<0.000000e+00> : vector<1x8xf32>
    %14 = tpu.matmul %10, %3, %cst_10 {dimension_numbers = #tpu.dot_dimension_numbers<[1], [0], [0], [1], [0, 0, 1, 1], [], []>} : vector<1x8xf32>, vector<8x8xf32>, vector<1x8xf32> -> vector<1x8xf32>
    %15 = tpu.iota {dimensions = array<i32: 0>} : vector<8x8xi32>
    %16 = tpu.iota {dimensions = array<i32: 1>} : vector<8x8xi32>
    %17 = arith.cmpi eq, %15, %16 : vector<8x8xi32>
    %18 = arith.extui %17 : vector<8x8xi1> to vector<8x8xi32>
    %19 = arith.sitofp %18 : vector<8x8xi32> to vector<8x8xf32>
    %20 = vector.broadcast %13 : vector<1x8xf32> to vector<8x8xf32>
    %21 = arith.mulf %19, %20 : vector<8x8xf32>
    %cst_11 = arith.constant dense<0.000000e+00> : vector<8xf32>
    %22 = vector.multi_reduction <add>, %21, %cst_11 [1] : vector<8x8xf32> to vector<8xf32>
    %23 = vector.shape_cast %22 : vector<8xf32> to vector<8x1xf32>
    %24 = vector.broadcast %14 : vector<1x8xf32> to vector<8x8xf32>
    %25 = arith.mulf %19, %24 : vector<8x8xf32>
    %cst_12 = arith.constant dense<0.000000e+00> : vector<8xf32>
    %26 = vector.multi_reduction <add>, %25, %cst_12 [1] : vector<8x8xf32> to vector<8xf32>
    %27 = vector.shape_cast %26 : vector<8xf32> to vector<8x1xf32>
    %28 = arith.addf %13, %14 : vector<1x8xf32>
    %cst_13 = arith.constant 0.000000e+00 : f32
    %29 = vector.broadcast %cst_13 : f32 to vector<1x8xf32>
    %30 = arith.cmpf oeq, %28, %29 : vector<1x8xf32>
    %31 = arith.addf %2, %3 : vector<8x8xf32>
    %cst_14 = arith.constant 0.000000e+00 : f32
    %32 = vector.broadcast %cst_14 : f32 to vector<8x8xf32>
    %33 = arith.cmpf oeq, %31, %32 : vector<8x8xf32>
    %c0_15 = arith.constant 0 : index
    %c0_16 = arith.constant 0 : index
    %34 = vector.load %arg4[%c0_15, %c0_16] : memref<48x16xf32, #tpu.memory_space<vmem>>, vector<48x16xf32>
    %c0_17 = arith.constant 0 : index
    %c0_18 = arith.constant 0 : index
    %35 = vector.load %arg8[%c0_17, %c0_18] : memref<16x32xf32, #tpu.memory_space<vmem>>, vector<16x32xf32>
    %cst_19 = arith.constant dense<0.000000e+00> : vector<48x32xf32>
    %36 = tpu.matmul %34, %35, %cst_19 {dimension_numbers = #tpu.dot_dimension_numbers<[1], [0], [0], [1], [0, 0, 1, 1], [], []>} : vector<48x16xf32>, vector<16x32xf32>, vector<48x32xf32> -> vector<48x32xf32>
    %c0_20 = arith.constant 0 : index
    %c0_21 = arith.constant 0 : index
    %37 = vector.load %arg9[%c0_20, %c0_21] : memref<1x32xf32, #tpu.memory_space<vmem>>, vector<1x32xf32>
    %38 = vector.broadcast %37 : vector<1x32xf32> to vector<48x32xf32>
    %39 = arith.addf %36, %38 : vector<48x32xf32>
    %cst_22 = arith.constant 0.000000e+00 : f32
    %40 = vector.broadcast %cst_22 : f32 to vector<48x32xf32>
    %41 = arith.maximumf %39, %40 : vector<48x32xf32>
    %42 = vector.extract_strided_slice %41 {offsets = [0, 0], sizes = [32, 32], strides = [1, 1]} : vector<48x32xf32> to vector<32x32xf32>
    %43 = vector.extract_strided_slice %41 {offsets = [32, 0], sizes = [16, 32], strides = [1, 1]} : vector<48x32xf32> to vector<16x32xf32>
    %c0_23 = arith.constant 0 : index
    %c0_24 = arith.constant 0 : index
    %44 = vector.load %arg10[%c0_23, %c0_24] : memref<32x64xf32, #tpu.memory_space<vmem>>, vector<32x64xf32>
    %cst_25 = arith.constant dense<0.000000e+00> : vector<8x64xf32>
    %45 = tpu.matmul %0, %44, %cst_25 {dimension_numbers = #tpu.dot_dimension_numbers<[1], [0], [0], [1], [0, 0, 1, 1], [], []>} : vector<8x32xf32>, vector<32x64xf32>, vector<8x64xf32> -> vector<8x64xf32>
    %c0_26 = arith.constant 0 : index
    %c0_27 = arith.constant 0 : index
    %46 = vector.load %arg13[%c0_26, %c0_27] : memref<32x64xf32, #tpu.memory_space<vmem>>, vector<32x64xf32>
    %cst_28 = arith.constant dense<0.000000e+00> : vector<16x64xf32>
    %47 = tpu.matmul %43, %46, %cst_28 {dimension_numbers = #tpu.dot_dimension_numbers<[1], [0], [0], [1], [0, 0, 1, 1], [], []>} : vector<16x32xf32>, vector<32x64xf32>, vector<16x64xf32> -> vector<16x64xf32>
    %c0_29 = arith.constant 0 : index
    %c0_30 = arith.constant 0 : index
    %48 = vector.load %arg14[%c0_29, %c0_30] : memref<1x64xf32, #tpu.memory_space<vmem>>, vector<1x64xf32>
    %49 = vector.broadcast %48 : vector<1x64xf32> to vector<16x64xf32>
    %50 = arith.addf %47, %49 : vector<16x64xf32>
    %51 = arith.addf %11, %12 : vector<1x32xf32>
    %c0_31 = arith.constant 0 : index
    %c0_32 = arith.constant 0 : index
    %52 = vector.load %arg15[%c0_31, %c0_32] : memref<32x128xf32, #tpu.memory_space<vmem>>, vector<32x128xf32>
    %cst_33 = arith.constant dense<0.000000e+00> : vector<1x128xf32>
    %53 = tpu.matmul %51, %52, %cst_33 {dimension_numbers = #tpu.dot_dimension_numbers<[1], [0], [0], [1], [0, 0, 1, 1], [], []>} : vector<1x32xf32>, vector<32x128xf32>, vector<1x128xf32> -> vector<1x128xf32>
    %c0_34 = arith.constant 0 : index
    %c0_35 = arith.constant 0 : index
    %54 = vector.load %arg16[%c0_34, %c0_35] : memref<1x128xf32, #tpu.memory_space<vmem>>, vector<1x128xf32>
    %55 = arith.addf %53, %54 : vector<1x128xf32>
    %c0_36 = arith.constant 0 : index
    %c0_37 = arith.constant 0 : index
    %56 = vector.load %arg15[%c0_36, %c0_37] : memref<32x128xf32, #tpu.memory_space<vmem>>, vector<32x128xf32>
    %cst_38 = arith.constant dense<0.000000e+00> : vector<1x128xf32>
    %57 = tpu.matmul %11, %56, %cst_38 {dimension_numbers = #tpu.dot_dimension_numbers<[1], [0], [0], [1], [0, 0, 1, 1], [], []>} : vector<1x32xf32>, vector<32x128xf32>, vector<1x128xf32> -> vector<1x128xf32>
    %c0_39 = arith.constant 0 : index
    %c0_40 = arith.constant 0 : index
    %58 = vector.load %arg16[%c0_39, %c0_40] : memref<1x128xf32, #tpu.memory_space<vmem>>, vector<1x128xf32>
    %59 = arith.addf %57, %58 : vector<1x128xf32>
    %c0_41 = arith.constant 0 : index
    %c0_42 = arith.constant 0 : index
    %60 = vector.load %arg17[%c0_41, %c0_42] : memref<32x128xf32, #tpu.memory_space<vmem>>, vector<32x128xf32>
    %cst_43 = arith.constant dense<0.000000e+00> : vector<32x128xf32>
    %61 = tpu.matmul %42, %60, %cst_43 {dimension_numbers = #tpu.dot_dimension_numbers<[1], [0], [0], [1], [0, 0, 1, 1], [], []>} : vector<32x32xf32>, vector<32x128xf32>, vector<32x128xf32> -> vector<32x128xf32>
    %c0_44 = arith.constant 0 : index
    %c0_45 = arith.constant 0 : index
    %62 = vector.load %arg18[%c0_44, %c0_45] : memref<1x128xf32, #tpu.memory_space<vmem>>, vector<1x128xf32>
    %63 = vector.broadcast %62 : vector<1x128xf32> to vector<32x128xf32>
    %64 = arith.addf %61, %63 : vector<32x128xf32>
    %c0_46 = arith.constant 0 : index
    %c0_47 = arith.constant 0 : index
    %65 = vector.load %arg11[%c0_46, %c0_47] : memref<2x32xf32, #tpu.memory_space<vmem>>, vector<2x32xf32>
    %c0_48 = arith.constant 0 : index
    %c0_49 = arith.constant 0 : index
    %66 = vector.load %arg12[%c0_48, %c0_49] : memref<2x32xf32, #tpu.memory_space<vmem>>, vector<2x32xf32>
    %c0_50 = arith.constant 0 : index
    %c0_51 = arith.constant 0 : index
    %67 = vector.load %arg19[%c0_50, %c0_51] : memref<64x128xf32, #tpu.memory_space<vmem>>, vector<64x128xf32>
    %c0_52 = arith.constant 0 : index
    %c0_53 = arith.constant 0 : index
    %68 = vector.load %arg20[%c0_52, %c0_53] : memref<2x128xf32, #tpu.memory_space<vmem>>, vector<2x128xf32>
    %69 = vector.extract_strided_slice %45 {offsets = [0, 0], sizes = [8, 32], strides = [1, 1]} : vector<8x64xf32> to vector<8x32xf32>
    %70 = vector.extract_strided_slice %50 {offsets = [0, 0], sizes = [8, 32], strides = [1, 1]} : vector<16x64xf32> to vector<8x32xf32>
    %71 = vector.extract_strided_slice %50 {offsets = [8, 0], sizes = [8, 32], strides = [1, 1]} : vector<16x64xf32> to vector<8x32xf32>
    %72 = arith.addf %69, %71 : vector<8x32xf32>
    %73 = arith.addf %72, %70 : vector<8x32xf32>
    %74 = vector.extract_strided_slice %65 {offsets = [0, 0], sizes = [1, 32], strides = [1, 1]} : vector<2x32xf32> to vector<1x32xf32>
    %cst_54 = arith.constant dense<0.000000e+00> : vector<8x1xf32>
    %75 = tpu.matmul %69, %74, %cst_54 {dimension_numbers = #tpu.dot_dimension_numbers<[1], [1], [0], [0], [0, 0, 1, 0], [], []>} : vector<8x32xf32>, vector<1x32xf32>, vector<8x1xf32> -> vector<8x1xf32>
    %76 = vector.extract_strided_slice %66 {offsets = [0, 0], sizes = [1, 32], strides = [1, 1]} : vector<2x32xf32> to vector<1x32xf32>
    %cst_55 = arith.constant dense<0.000000e+00> : vector<1x8xf32>
    %77 = tpu.matmul %76, %73, %cst_55 {dimension_numbers = #tpu.dot_dimension_numbers<[1], [1], [0], [0], [0, 0, 1, 0], [], []>} : vector<1x32xf32>, vector<8x32xf32>, vector<1x8xf32> -> vector<1x8xf32>
    %78 = vector.broadcast %75 : vector<8x1xf32> to vector<8x8xf32>
    %79 = vector.broadcast %77 : vector<1x8xf32> to vector<8x8xf32>
    %80 = arith.addf %78, %79 : vector<8x8xf32>
    %cst_56 = arith.constant 0.000000e+00 : f32
    %81 = vector.broadcast %cst_56 : f32 to vector<8x8xf32>
    %82 = arith.cmpf oge, %80, %81 : vector<8x8xf32>
    %cst_57 = arith.constant 0.00999999977 : f32
    %83 = vector.broadcast %cst_57 : f32 to vector<8x8xf32>
    %84 = arith.mulf %83, %80 : vector<8x8xf32>
    %85 = arith.select %82, %80, %84 : vector<8x8xi1>, vector<8x8xf32>
    %86 = arith.mulf %85, %2 : vector<8x8xf32>
    %87 = arith.mulf %85, %3 : vector<8x8xf32>
    %88 = arith.addf %86, %87 : vector<8x8xf32>
    %cst_58 = arith.constant -1.000000e+09 : f32
    %89 = vector.broadcast %cst_58 : f32 to vector<8x8xf32>
    %90 = arith.select %33, %89, %88 : vector<8x8xi1>, vector<8x8xf32>
    %cst_59 = arith.constant dense<0xFF800000> : vector<8xf32>
    %91 = vector.multi_reduction <maximumf>, %90, %cst_59 [1] : vector<8x8xf32> to vector<8xf32>
    %92 = vector.shape_cast %91 : vector<8xf32> to vector<8x1xf32>
    %93 = vector.broadcast %92 : vector<8x1xf32> to vector<8x8xf32>
    %94 = arith.subf %90, %93 : vector<8x8xf32>
    %95 = math.exp %94 : vector<8x8xf32>
    %cst_60 = arith.constant dense<0.000000e+00> : vector<8xf32>
    %96 = vector.multi_reduction <add>, %95, %cst_60 [1] : vector<8x8xf32> to vector<8xf32>
    %97 = vector.shape_cast %96 : vector<8xf32> to vector<8x1xf32>
    %98 = tpu.reciprocal %97 {approx = true} : vector<8x1xf32> -> vector<8x1xf32>
    %99 = vector.broadcast %98 : vector<8x1xf32> to vector<8x8xf32>
    %100 = arith.mulf %95, %99 : vector<8x8xf32>
    %cst_61 = arith.constant dense<0.000000e+00> : vector<8x32xf32>
    %101 = tpu.matmul %100, %69, %cst_61 {dimension_numbers = #tpu.dot_dimension_numbers<[1], [0], [0], [1], [0, 0, 1, 1], [], []>} : vector<8x8xf32>, vector<8x32xf32>, vector<8x32xf32> -> vector<8x32xf32>
    %102 = vector.extract_strided_slice %67 {offsets = [0, 0], sizes = [32, 128], strides = [1, 1]} : vector<64x128xf32> to vector<32x128xf32>
    %cst_62 = arith.constant dense<0.000000e+00> : vector<8x128xf32>
    %103 = tpu.matmul %101, %102, %cst_62 {dimension_numbers = #tpu.dot_dimension_numbers<[1], [0], [0], [1], [0, 0, 1, 1], [], []>} : vector<8x32xf32>, vector<32x128xf32>, vector<8x128xf32> -> vector<8x128xf32>
    %104 = vector.extract_strided_slice %68 {offsets = [0, 0], sizes = [1, 128], strides = [1, 1]} : vector<2x128xf32> to vector<1x128xf32>
    %105 = vector.broadcast %104 : vector<1x128xf32> to vector<8x128xf32>
    %106 = arith.addf %103, %105 : vector<8x128xf32>
    %107 = vector.extract_strided_slice %106 {offsets = [0, 0], sizes = [8, 32], strides = [1, 1]} : vector<8x128xf32> to vector<8x32xf32>
    %108 = vector.extract_strided_slice %106 {offsets = [0, 32], sizes = [8, 32], strides = [1, 1]} : vector<8x128xf32> to vector<8x32xf32>
    %109 = vector.extract_strided_slice %106 {offsets = [0, 64], sizes = [8, 32], strides = [1, 1]} : vector<8x128xf32> to vector<8x32xf32>
    %110 = vector.extract_strided_slice %106 {offsets = [0, 96], sizes = [8, 32], strides = [1, 1]} : vector<8x128xf32> to vector<8x32xf32>
    %111 = vector.extract_strided_slice %64 {offsets = [0, 0], sizes = [8, 32], strides = [1, 1]} : vector<32x128xf32> to vector<8x32xf32>
    %112 = vector.extract_strided_slice %64 {offsets = [8, 0], sizes = [8, 32], strides = [1, 1]} : vector<32x128xf32> to vector<8x32xf32>
    %113 = vector.extract_strided_slice %64 {offsets = [16, 32], sizes = [8, 32], strides = [1, 1]} : vector<32x128xf32> to vector<8x32xf32>
    %114 = vector.extract_strided_slice %64 {offsets = [24, 32], sizes = [8, 32], strides = [1, 1]} : vector<32x128xf32> to vector<8x32xf32>
    %115 = vector.extract_strided_slice %55 {offsets = [0, 0], sizes = [1, 32], strides = [1, 1]} : vector<1x128xf32> to vector<1x32xf32>
    %116 = vector.extract_strided_slice %59 {offsets = [0, 32], sizes = [1, 32], strides = [1, 1]} : vector<1x128xf32> to vector<1x32xf32>
    %117 = arith.addf %107, %111 : vector<8x32xf32>
    %118 = arith.addf %108, %111 : vector<8x32xf32>
    %119 = arith.addf %107, %112 : vector<8x32xf32>
    %120 = arith.addf %108, %112 : vector<8x32xf32>
    %cst_63 = arith.constant dense<0.000000e+00> : vector<1x8xf32>
    %121 = tpu.matmul %115, %117, %cst_63 {dimension_numbers = #tpu.dot_dimension_numbers<[1], [1], [0], [0], [0, 0, 1, 0], [], []>} : vector<1x32xf32>, vector<8x32xf32>, vector<1x8xf32> -> vector<1x8xf32>
    %cst_64 = arith.constant 0.176776692 : f32
    %122 = vector.broadcast %cst_64 : f32 to vector<1x8xf32>
    %123 = arith.mulf %121, %122 : vector<1x8xf32>
    %cst_65 = arith.constant dense<0.000000e+00> : vector<1x8xf32>
    %124 = tpu.matmul %115, %119, %cst_65 {dimension_numbers = #tpu.dot_dimension_numbers<[1], [1], [0], [0], [0, 0, 1, 0], [], []>} : vector<1x32xf32>, vector<8x32xf32>, vector<1x8xf32> -> vector<1x8xf32>
    %cst_66 = arith.constant 0.176776692 : f32
    %125 = vector.broadcast %cst_66 : f32 to vector<1x8xf32>
    %126 = arith.mulf %124, %125 : vector<1x8xf32>
    %127 = arith.mulf %123, %13 : vector<1x8xf32>
    %128 = arith.mulf %126, %14 : vector<1x8xf32>
    %129 = arith.addf %127, %128 : vector<1x8xf32>
    %cst_67 = arith.constant -1.000000e+09 : f32
    %130 = vector.broadcast %cst_67 : f32 to vector<1x8xf32>
    %131 = arith.select %30, %130, %129 : vector<1x8xi1>, vector<1x8xf32>
    %cst_68 = arith.constant dense<0xFF800000> : vector<1xf32>
    %132 = vector.multi_reduction <maximumf>, %131, %cst_68 [1] : vector<1x8xf32> to vector<1xf32>
    %133 = vector.shape_cast %132 : vector<1xf32> to vector<1x1xf32>
    %134 = vector.broadcast %133 : vector<1x1xf32> to vector<1x8xf32>
    %135 = arith.subf %131, %134 : vector<1x8xf32>
    %136 = math.exp %135 : vector<1x8xf32>
    %cst_69 = arith.constant dense<0.000000e+00> : vector<1xf32>
    %137 = vector.multi_reduction <add>, %136, %cst_69 [1] : vector<1x8xf32> to vector<1xf32>
    %138 = vector.shape_cast %137 : vector<1xf32> to vector<1x1xf32>
    %139 = tpu.reciprocal %138 {approx = true} : vector<1x1xf32> -> vector<1x1xf32>
    %140 = vector.broadcast %139 : vector<1x1xf32> to vector<1x8xf32>
    %141 = arith.mulf %136, %140 : vector<1x8xf32>
    %142 = vector.broadcast %141 : vector<1x8xf32> to vector<8x8xf32>
    %143 = arith.mulf %19, %142 : vector<8x8xf32>
    %cst_70 = arith.constant dense<0.000000e+00> : vector<8xf32>
    %144 = vector.multi_reduction <add>, %143, %cst_70 [1] : vector<8x8xf32> to vector<8xf32>
    %145 = vector.shape_cast %144 : vector<8xf32> to vector<8x1xf32>
    %146 = arith.mulf %145, %23 : vector<8x1xf32>
    %147 = arith.mulf %145, %27 : vector<8x1xf32>
    %148 = arith.addf %146, %147 : vector<8x1xf32>
    %149 = vector.broadcast %148 : vector<8x1xf32> to vector<8x32xf32>
    %150 = vector.broadcast %115 : vector<1x32xf32> to vector<8x32xf32>
    %151 = arith.mulf %149, %150 : vector<8x32xf32>
    %152 = vector.broadcast %146 : vector<8x1xf32> to vector<8x32xf32>
    %153 = arith.mulf %152, %118 : vector<8x32xf32>
    %154 = vector.broadcast %147 : vector<8x1xf32> to vector<8x32xf32>
    %155 = arith.mulf %154, %120 : vector<8x32xf32>
    %156 = arith.addf %153, %155 : vector<8x32xf32>
    %157 = arith.addf %151, %156 : vector<8x32xf32>
    %158 = arith.addf %109, %113 : vector<8x32xf32>
    %159 = arith.addf %110, %113 : vector<8x32xf32>
    %160 = arith.addf %109, %114 : vector<8x32xf32>
    %161 = arith.addf %110, %114 : vector<8x32xf32>
    %cst_71 = arith.constant dense<0.000000e+00> : vector<1x8xf32>
    %162 = tpu.matmul %116, %158, %cst_71 {dimension_numbers = #tpu.dot_dimension_numbers<[1], [1], [0], [0], [0, 0, 1, 0], [], []>} : vector<1x32xf32>, vector<8x32xf32>, vector<1x8xf32> -> vector<1x8xf32>
    %cst_72 = arith.constant 0.176776692 : f32
    %163 = vector.broadcast %cst_72 : f32 to vector<1x8xf32>
    %164 = arith.mulf %162, %163 : vector<1x8xf32>
    %cst_73 = arith.constant dense<0.000000e+00> : vector<1x8xf32>
    %165 = tpu.matmul %116, %160, %cst_73 {dimension_numbers = #tpu.dot_dimension_numbers<[1], [1], [0], [0], [0, 0, 1, 0], [], []>} : vector<1x32xf32>, vector<8x32xf32>, vector<1x8xf32> -> vector<1x8xf32>
    %cst_74 = arith.constant 0.176776692 : f32
    %166 = vector.broadcast %cst_74 : f32 to vector<1x8xf32>
    %167 = arith.mulf %165, %166 : vector<1x8xf32>
    %168 = arith.mulf %164, %13 : vector<1x8xf32>
    %169 = arith.mulf %167, %14 : vector<1x8xf32>
    %170 = arith.addf %168, %169 : vector<1x8xf32>
    %cst_75 = arith.constant -1.000000e+09 : f32
    %171 = vector.broadcast %cst_75 : f32 to vector<1x8xf32>
    %172 = arith.select %30, %171, %170 : vector<1x8xi1>, vector<1x8xf32>
    %cst_76 = arith.constant dense<0xFF800000> : vector<1xf32>
    %173 = vector.multi_reduction <maximumf>, %172, %cst_76 [1] : vector<1x8xf32> to vector<1xf32>
    %174 = vector.shape_cast %173 : vector<1xf32> to vector<1x1xf32>
    %175 = vector.broadcast %174 : vector<1x1xf32> to vector<1x8xf32>
    %176 = arith.subf %172, %175 : vector<1x8xf32>
    %177 = math.exp %176 : vector<1x8xf32>
    %cst_77 = arith.constant dense<0.000000e+00> : vector<1xf32>
    %178 = vector.multi_reduction <add>, %177, %cst_77 [1] : vector<1x8xf32> to vector<1xf32>
    %179 = vector.shape_cast %178 : vector<1xf32> to vector<1x1xf32>
    %180 = tpu.reciprocal %179 {approx = true} : vector<1x1xf32> -> vector<1x1xf32>
    %181 = vector.broadcast %180 : vector<1x1xf32> to vector<1x8xf32>
    %182 = arith.mulf %177, %181 : vector<1x8xf32>
    %183 = vector.broadcast %182 : vector<1x8xf32> to vector<8x8xf32>
    %184 = arith.mulf %19, %183 : vector<8x8xf32>
    %cst_78 = arith.constant dense<0.000000e+00> : vector<8xf32>
    %185 = vector.multi_reduction <add>, %184, %cst_78 [1] : vector<8x8xf32> to vector<8xf32>
    %186 = vector.shape_cast %185 : vector<8xf32> to vector<8x1xf32>
    %187 = arith.mulf %186, %23 : vector<8x1xf32>
    %188 = arith.mulf %186, %27 : vector<8x1xf32>
    %189 = arith.addf %187, %188 : vector<8x1xf32>
    %190 = vector.broadcast %189 : vector<8x1xf32> to vector<8x32xf32>
    %191 = vector.broadcast %116 : vector<1x32xf32> to vector<8x32xf32>
    %192 = arith.mulf %190, %191 : vector<8x32xf32>
    %193 = vector.broadcast %187 : vector<8x1xf32> to vector<8x32xf32>
    %194 = arith.mulf %193, %159 : vector<8x32xf32>
    %195 = vector.broadcast %188 : vector<8x1xf32> to vector<8x32xf32>
    %196 = arith.mulf %195, %161 : vector<8x32xf32>
    %197 = arith.addf %194, %196 : vector<8x32xf32>
    %198 = arith.addf %192, %197 : vector<8x32xf32>
    %199 = arith.addf %101, %0 : vector<8x32xf32>
    %200 = arith.addf %199, %157 : vector<8x32xf32>
    %201 = arith.addf %200, %198 : vector<8x32xf32>
    %cst_79 = arith.constant 0.000000e+00 : f32
    %202 = vector.broadcast %cst_79 : f32 to vector<8x32xf32>
    %203 = arith.maximumf %201, %202 : vector<8x32xf32>
    %c0_80 = arith.constant 0 : index
    %c0_81 = arith.constant 0 : index
    %204 = vector.load %arg25[%c0_80, %c0_81] : memref<4x8xf32, #tpu.memory_space<vmem>>, vector<1x8xf32>
    tpu.vector_store %arg25[%c0_80, %c0_81], %141 {strides = array<i32>} : memref<4x8xf32, #tpu.memory_space<vmem>>, vector<1x8xf32>,
    %c1 = arith.constant 1 : index
    %c0_82 = arith.constant 0 : index
    %205 = vector.load %arg25[%c1, %c0_82] : memref<4x8xf32, #tpu.memory_space<vmem>>, vector<1x8xf32>
    tpu.vector_store %arg25[%c1, %c0_82], %182 {strides = array<i32>} : memref<4x8xf32, #tpu.memory_space<vmem>>, vector<1x8xf32>,
    %206 = vector.extract_strided_slice %45 {offsets = [0, 32], sizes = [8, 32], strides = [1, 1]} : vector<8x64xf32> to vector<8x32xf32>
    %207 = vector.extract_strided_slice %50 {offsets = [0, 32], sizes = [8, 32], strides = [1, 1]} : vector<16x64xf32> to vector<8x32xf32>
    %208 = vector.extract_strided_slice %50 {offsets = [8, 32], sizes = [8, 32], strides = [1, 1]} : vector<16x64xf32> to vector<8x32xf32>
    %209 = arith.addf %206, %208 : vector<8x32xf32>
    %210 = arith.addf %209, %207 : vector<8x32xf32>
    %211 = vector.extract_strided_slice %65 {offsets = [1, 0], sizes = [1, 32], strides = [1, 1]} : vector<2x32xf32> to vector<1x32xf32>
    %cst_83 = arith.constant dense<0.000000e+00> : vector<8x1xf32>
    %212 = tpu.matmul %206, %211, %cst_83 {dimension_numbers = #tpu.dot_dimension_numbers<[1], [1], [0], [0], [0, 0, 1, 0], [], []>} : vector<8x32xf32>, vector<1x32xf32>, vector<8x1xf32> -> vector<8x1xf32>
    %213 = vector.extract_strided_slice %66 {offsets = [1, 0], sizes = [1, 32], strides = [1, 1]} : vector<2x32xf32> to vector<1x32xf32>
    %cst_84 = arith.constant dense<0.000000e+00> : vector<1x8xf32>
    %214 = tpu.matmul %213, %210, %cst_84 {dimension_numbers = #tpu.dot_dimension_numbers<[1], [1], [0], [0], [0, 0, 1, 0], [], []>} : vector<1x32xf32>, vector<8x32xf32>, vector<1x8xf32> -> vector<1x8xf32>
    %215 = vector.broadcast %212 : vector<8x1xf32> to vector<8x8xf32>
    %216 = vector.broadcast %214 : vector<1x8xf32> to vector<8x8xf32>
    %217 = arith.addf %215, %216 : vector<8x8xf32>
    %cst_85 = arith.constant 0.000000e+00 : f32
    %218 = vector.broadcast %cst_85 : f32 to vector<8x8xf32>
    %219 = arith.cmpf oge, %217, %218 : vector<8x8xf32>
    %cst_86 = arith.constant 0.00999999977 : f32
    %220 = vector.broadcast %cst_86 : f32 to vector<8x8xf32>
    %221 = arith.mulf %220, %217 : vector<8x8xf32>
    %222 = arith.select %219, %217, %221 : vector<8x8xi1>, vector<8x8xf32>
    %223 = arith.mulf %222, %2 : vector<8x8xf32>
    %224 = arith.mulf %222, %3 : vector<8x8xf32>
    %225 = arith.addf %223, %224 : vector<8x8xf32>
    %cst_87 = arith.constant -1.000000e+09 : f32
    %226 = vector.broadcast %cst_87 : f32 to vector<8x8xf32>
    %227 = arith.select %33, %226, %225 : vector<8x8xi1>, vector<8x8xf32>
    %cst_88 = arith.constant dense<0xFF800000> : vector<8xf32>
    %228 = vector.multi_reduction <maximumf>, %227, %cst_88 [1] : vector<8x8xf32> to vector<8xf32>
    %229 = vector.shape_cast %228 : vector<8xf32> to vector<8x1xf32>
    %230 = vector.broadcast %229 : vector<8x1xf32> to vector<8x8xf32>
    %231 = arith.subf %227, %230 : vector<8x8xf32>
    %232 = math.exp %231 : vector<8x8xf32>
    %cst_89 = arith.constant dense<0.000000e+00> : vector<8xf32>
    %233 = vector.multi_reduction <add>, %232, %cst_89 [1] : vector<8x8xf32> to vector<8xf32>
    %234 = vector.shape_cast %233 : vector<8xf32> to vector<8x1xf32>
    %235 = tpu.reciprocal %234 {approx = true} : vector<8x1xf32> -> vector<8x1xf32>
    %236 = vector.broadcast %235 : vector<8x1xf32> to vector<8x8xf32>
    %237 = arith.mulf %232, %236 : vector<8x8xf32>
    %cst_90 = arith.constant dense<0.000000e+00> : vector<8x32xf32>
    %238 = tpu.matmul %237, %206, %cst_90 {dimension_numbers = #tpu.dot_dimension_numbers<[1], [0], [0], [1], [0, 0, 1, 1], [], []>} : vector<8x8xf32>, vector<8x32xf32>, vector<8x32xf32> -> vector<8x32xf32>
    %239 = vector.extract_strided_slice %67 {offsets = [32, 0], sizes = [32, 128], strides = [1, 1]} : vector<64x128xf32> to vector<32x128xf32>
    %cst_91 = arith.constant dense<0.000000e+00> : vector<8x128xf32>
    %240 = tpu.matmul %238, %239, %cst_91 {dimension_numbers = #tpu.dot_dimension_numbers<[1], [0], [0], [1], [0, 0, 1, 1], [], []>} : vector<8x32xf32>, vector<32x128xf32>, vector<8x128xf32> -> vector<8x128xf32>
    %241 = vector.extract_strided_slice %68 {offsets = [1, 0], sizes = [1, 128], strides = [1, 1]} : vector<2x128xf32> to vector<1x128xf32>
    %242 = vector.broadcast %241 : vector<1x128xf32> to vector<8x128xf32>
    %243 = arith.addf %240, %242 : vector<8x128xf32>
    %244 = vector.extract_strided_slice %243 {offsets = [0, 0], sizes = [8, 32], strides = [1, 1]} : vector<8x128xf32> to vector<8x32xf32>
    %245 = vector.extract_strided_slice %243 {offsets = [0, 32], sizes = [8, 32], strides = [1, 1]} : vector<8x128xf32> to vector<8x32xf32>
    %246 = vector.extract_strided_slice %243 {offsets = [0, 64], sizes = [8, 32], strides = [1, 1]} : vector<8x128xf32> to vector<8x32xf32>
    %247 = vector.extract_strided_slice %243 {offsets = [0, 96], sizes = [8, 32], strides = [1, 1]} : vector<8x128xf32> to vector<8x32xf32>
    %248 = vector.extract_strided_slice %64 {offsets = [0, 64], sizes = [8, 32], strides = [1, 1]} : vector<32x128xf32> to vector<8x32xf32>
    %249 = vector.extract_strided_slice %64 {offsets = [8, 64], sizes = [8, 32], strides = [1, 1]} : vector<32x128xf32> to vector<8x32xf32>
    %250 = vector.extract_strided_slice %64 {offsets = [16, 96], sizes = [8, 32], strides = [1, 1]} : vector<32x128xf32> to vector<8x32xf32>
    %251 = vector.extract_strided_slice %64 {offsets = [24, 96], sizes = [8, 32], strides = [1, 1]} : vector<32x128xf32> to vector<8x32xf32>
    %252 = vector.extract_strided_slice %55 {offsets = [0, 64], sizes = [1, 32], strides = [1, 1]} : vector<1x128xf32> to vector<1x32xf32>
    %253 = vector.extract_strided_slice %59 {offsets = [0, 96], sizes = [1, 32], strides = [1, 1]} : vector<1x128xf32> to vector<1x32xf32>
    %254 = arith.addf %244, %248 : vector<8x32xf32>
    %255 = arith.addf %245, %248 : vector<8x32xf32>
    %256 = arith.addf %244, %249 : vector<8x32xf32>
    %257 = arith.addf %245, %249 : vector<8x32xf32>
    %cst_92 = arith.constant dense<0.000000e+00> : vector<1x8xf32>
    %258 = tpu.matmul %252, %254, %cst_92 {dimension_numbers = #tpu.dot_dimension_numbers<[1], [1], [0], [0], [0, 0, 1, 0], [], []>} : vector<1x32xf32>, vector<8x32xf32>, vector<1x8xf32> -> vector<1x8xf32>
    %cst_93 = arith.constant 0.176776692 : f32
    %259 = vector.broadcast %cst_93 : f32 to vector<1x8xf32>
    %260 = arith.mulf %258, %259 : vector<1x8xf32>
    %cst_94 = arith.constant dense<0.000000e+00> : vector<1x8xf32>
    %261 = tpu.matmul %252, %256, %cst_94 {dimension_numbers = #tpu.dot_dimension_numbers<[1], [1], [0], [0], [0, 0, 1, 0], [], []>} : vector<1x32xf32>, vector<8x32xf32>, vector<1x8xf32> -> vector<1x8xf32>
    %cst_95 = arith.constant 0.176776692 : f32
    %262 = vector.broadcast %cst_95 : f32 to vector<1x8xf32>
    %263 = arith.mulf %261, %262 : vector<1x8xf32>
    %264 = arith.mulf %260, %13 : vector<1x8xf32>
    %265 = arith.mulf %263, %14 : vector<1x8xf32>
    %266 = arith.addf %264, %265 : vector<1x8xf32>
    %cst_96 = arith.constant -1.000000e+09 : f32
    %267 = vector.broadcast %cst_96 : f32 to vector<1x8xf32>
    %268 = arith.select %30, %267, %266 : vector<1x8xi1>, vector<1x8xf32>
    %cst_97 = arith.constant dense<0xFF800000> : vector<1xf32>
    %269 = vector.multi_reduction <maximumf>, %268, %cst_97 [1] : vector<1x8xf32> to vector<1xf32>
    %270 = vector.shape_cast %269 : vector<1xf32> to vector<1x1xf32>
    %271 = vector.broadcast %270 : vector<1x1xf32> to vector<1x8xf32>
    %272 = arith.subf %268, %271 : vector<1x8xf32>
    %273 = math.exp %272 : vector<1x8xf32>
    %cst_98 = arith.constant dense<0.000000e+00> : vector<1xf32>
    %274 = vector.multi_reduction <add>, %273, %cst_98 [1] : vector<1x8xf32> to vector<1xf32>
    %275 = vector.shape_cast %274 : vector<1xf32> to vector<1x1xf32>
    %276 = tpu.reciprocal %275 {approx = true} : vector<1x1xf32> -> vector<1x1xf32>
    %277 = vector.broadcast %276 : vector<1x1xf32> to vector<1x8xf32>
    %278 = arith.mulf %273, %277 : vector<1x8xf32>
    %279 = vector.broadcast %278 : vector<1x8xf32> to vector<8x8xf32>
    %280 = arith.mulf %19, %279 : vector<8x8xf32>
    %cst_99 = arith.constant dense<0.000000e+00> : vector<8xf32>
    %281 = vector.multi_reduction <add>, %280, %cst_99 [1] : vector<8x8xf32> to vector<8xf32>
    %282 = vector.shape_cast %281 : vector<8xf32> to vector<8x1xf32>
    %283 = arith.mulf %282, %23 : vector<8x1xf32>
    %284 = arith.mulf %282, %27 : vector<8x1xf32>
    %285 = arith.addf %283, %284 : vector<8x1xf32>
    %286 = vector.broadcast %285 : vector<8x1xf32> to vector<8x32xf32>
    %287 = vector.broadcast %252 : vector<1x32xf32> to vector<8x32xf32>
    %288 = arith.mulf %286, %287 : vector<8x32xf32>
    %289 = vector.broadcast %283 : vector<8x1xf32> to vector<8x32xf32>
    %290 = arith.mulf %289, %255 : vector<8x32xf32>
    %291 = vector.broadcast %284 : vector<8x1xf32> to vector<8x32xf32>
    %292 = arith.mulf %291, %257 : vector<8x32xf32>
    %293 = arith.addf %290, %292 : vector<8x32xf32>
    %294 = arith.addf %288, %293 : vector<8x32xf32>
    %295 = arith.addf %246, %250 : vector<8x32xf32>
    %296 = arith.addf %247, %250 : vector<8x32xf32>
    %297 = arith.addf %246, %251 : vector<8x32xf32>
    %298 = arith.addf %247, %251 : vector<8x32xf32>
    %cst_100 = arith.constant dense<0.000000e+00> : vector<1x8xf32>
    %299 = tpu.matmul %253, %295, %cst_100 {dimension_numbers = #tpu.dot_dimension_numbers<[1], [1], [0], [0], [0, 0, 1, 0], [], []>} : vector<1x32xf32>, vector<8x32xf32>, vector<1x8xf32> -> vector<1x8xf32>
    %cst_101 = arith.constant 0.176776692 : f32
    %300 = vector.broadcast %cst_101 : f32 to vector<1x8xf32>
    %301 = arith.mulf %299, %300 : vector<1x8xf32>
    %cst_102 = arith.constant dense<0.000000e+00> : vector<1x8xf32>
    %302 = tpu.matmul %253, %297, %cst_102 {dimension_numbers = #tpu.dot_dimension_numbers<[1], [1], [0], [0], [0, 0, 1, 0], [], []>} : vector<1x32xf32>, vector<8x32xf32>, vector<1x8xf32> -> vector<1x8xf32>
    %cst_103 = arith.constant 0.176776692 : f32
    %303 = vector.broadcast %cst_103 : f32 to vector<1x8xf32>
    %304 = arith.mulf %302, %303 : vector<1x8xf32>
    %305 = arith.mulf %301, %13 : vector<1x8xf32>
    %306 = arith.mulf %304, %14 : vector<1x8xf32>
    %307 = arith.addf %305, %306 : vector<1x8xf32>
    %cst_104 = arith.constant -1.000000e+09 : f32
    %308 = vector.broadcast %cst_104 : f32 to vector<1x8xf32>
    %309 = arith.select %30, %308, %307 : vector<1x8xi1>, vector<1x8xf32>
    %cst_105 = arith.constant dense<0xFF800000> : vector<1xf32>
    %310 = vector.multi_reduction <maximumf>, %309, %cst_105 [1] : vector<1x8xf32> to vector<1xf32>
    %311 = vector.shape_cast %310 : vector<1xf32> to vector<1x1xf32>
    %312 = vector.broadcast %311 : vector<1x1xf32> to vector<1x8xf32>
    %313 = arith.subf %309, %312 : vector<1x8xf32>
    %314 = math.exp %313 : vector<1x8xf32>
    %cst_106 = arith.constant dense<0.000000e+00> : vector<1xf32>
    %315 = vector.multi_reduction <add>, %314, %cst_106 [1] : vector<1x8xf32> to vector<1xf32>
    %316 = vector.shape_cast %315 : vector<1xf32> to vector<1x1xf32>
    %317 = tpu.reciprocal %316 {approx = true} : vector<1x1xf32> -> vector<1x1xf32>
    %318 = vector.broadcast %317 : vector<1x1xf32> to vector<1x8xf32>
    %319 = arith.mulf %314, %318 : vector<1x8xf32>
    %320 = vector.broadcast %319 : vector<1x8xf32> to vector<8x8xf32>
    %321 = arith.mulf %19, %320 : vector<8x8xf32>
    %cst_107 = arith.constant dense<0.000000e+00> : vector<8xf32>
    %322 = vector.multi_reduction <add>, %321, %cst_107 [1] : vector<8x8xf32> to vector<8xf32>
    %323 = vector.shape_cast %322 : vector<8xf32> to vector<8x1xf32>
    %324 = arith.mulf %323, %23 : vector<8x1xf32>
    %325 = arith.mulf %323, %27 : vector<8x1xf32>
    %326 = arith.addf %324, %325 : vector<8x1xf32>
    %327 = vector.broadcast %326 : vector<8x1xf32> to vector<8x32xf32>
    %328 = vector.broadcast %253 : vector<1x32xf32> to vector<8x32xf32>
    %329 = arith.mulf %327, %328 : vector<8x32xf32>
    %330 = vector.broadcast %324 : vector<8x1xf32> to vector<8x32xf32>
    %331 = arith.mulf %330, %296 : vector<8x32xf32>
    %332 = vector.broadcast %325 : vector<8x1xf32> to vector<8x32xf32>
    %333 = arith.mulf %332, %298 : vector<8x32xf32>
    %334 = arith.addf %331, %333 : vector<8x32xf32>
    %335 = arith.addf %329, %334 : vector<8x32xf32>
    %336 = arith.addf %238, %0 : vector<8x32xf32>
    %337 = arith.addf %336, %294 : vector<8x32xf32>
    %338 = arith.addf %337, %335 : vector<8x32xf32>
    %cst_108 = arith.constant 0.000000e+00 : f32
    %339 = vector.broadcast %cst_108 : f32 to vector<8x32xf32>
    %340 = arith.maximumf %338, %339 : vector<8x32xf32>
    %c2 = arith.constant 2 : index
    %c0_109 = arith.constant 0 : index
    %341 = vector.load %arg25[%c2, %c0_109] : memref<4x8xf32, #tpu.memory_space<vmem>>, vector<1x8xf32>
    tpu.vector_store %arg25[%c2, %c0_109], %278 {strides = array<i32>} : memref<4x8xf32, #tpu.memory_space<vmem>>, vector<1x8xf32>,
    %c3 = arith.constant 3 : index
    %c0_110 = arith.constant 0 : index
    %342 = vector.load %arg25[%c3, %c0_110] : memref<4x8xf32, #tpu.memory_space<vmem>>, vector<1x8xf32>
    tpu.vector_store %arg25[%c3, %c0_110], %319 {strides = array<i32>} : memref<4x8xf32, #tpu.memory_space<vmem>>, vector<1x8xf32>,
    %c0_111 = arith.constant 0 : index
    %c0_112 = arith.constant 0 : index
    %343 = vector.load %arg21[%c0_111, %c0_112] : memref<96x96xf32, #tpu.memory_space<vmem>>, vector<32x96xf32>
    %cst_113 = arith.constant dense<0.000000e+00> : vector<8x96xf32>
    %344 = tpu.matmul %0, %343, %cst_113 {dimension_numbers = #tpu.dot_dimension_numbers<[1], [0], [0], [1], [0, 0, 1, 1], [], []>} : vector<8x32xf32>, vector<32x96xf32>, vector<8x96xf32> -> vector<8x96xf32>
    %c32 = arith.constant 32 : index
    %c0_114 = arith.constant 0 : index
    %345 = vector.load %arg21[%c32, %c0_114] : memref<96x96xf32, #tpu.memory_space<vmem>>, vector<32x96xf32>
    %cst_115 = arith.constant dense<0.000000e+00> : vector<8x96xf32>
    %346 = tpu.matmul %203, %345, %cst_115 {dimension_numbers = #tpu.dot_dimension_numbers<[1], [0], [0], [1], [0, 0, 1, 1], [], []>} : vector<8x32xf32>, vector<32x96xf32>, vector<8x96xf32> -> vector<8x96xf32>
    %347 = arith.addf %344, %346 : vector<8x96xf32>
    %c64 = arith.constant 64 : index
    %c0_116 = arith.constant 0 : index
    %348 = vector.load %arg21[%c64, %c0_116] : memref<96x96xf32, #tpu.memory_space<vmem>>, vector<32x96xf32>
    %cst_117 = arith.constant dense<0.000000e+00> : vector<8x96xf32>
    %349 = tpu.matmul %340, %348, %cst_117 {dimension_numbers = #tpu.dot_dimension_numbers<[1], [0], [0], [1], [0, 0, 1, 1], [], []>} : vector<8x32xf32>, vector<32x96xf32>, vector<8x96xf32> -> vector<8x96xf32>
    %350 = arith.addf %347, %349 : vector<8x96xf32>
    %cst_118 = arith.constant 0.000000e+00 : f32
    %351 = vector.broadcast %cst_118 : f32 to vector<8x96xf32>
    %352 = arith.maximumf %350, %351 : vector<8x96xf32>
    %c0_119 = arith.constant 0 : index
    %c0_120 = arith.constant 0 : index
    %353 = vector.load %arg22[%c0_119, %c0_120] : memref<96x96xf32, #tpu.memory_space<vmem>>, vector<96x96xf32>
    %cst_121 = arith.constant dense<0.000000e+00> : vector<8x96xf32>
    %354 = tpu.matmul %352, %353, %cst_121 {dimension_numbers = #tpu.dot_dimension_numbers<[1], [0], [0], [1], [0, 0, 1, 1], [], []>} : vector<8x96xf32>, vector<96x96xf32>, vector<8x96xf32> -> vector<8x96xf32>
    %cst_122 = arith.constant 0.000000e+00 : f32
    %355 = vector.broadcast %cst_122 : f32 to vector<8x96xf32>
    %356 = arith.maximumf %354, %355 : vector<8x96xf32>
    %c0_123 = arith.constant 0 : index
    %c0_124 = arith.constant 0 : index
    %357 = vector.load %arg23[%c0_123, %c0_124] : memref<1x96xf32, #tpu.memory_space<vmem>>, vector<1x96xf32>
    %cst_125 = arith.constant dense<0.000000e+00> : vector<1x8xf32>
    %358 = tpu.matmul %357, %356, %cst_125 {dimension_numbers = #tpu.dot_dimension_numbers<[1], [1], [0], [0], [0, 0, 1, 0], [], []>} : vector<1x96xf32>, vector<8x96xf32>, vector<1x8xf32> -> vector<1x8xf32>
    %359 = arith.negf %358 : vector<1x8xf32>
    %360 = math.exp %359 : vector<1x8xf32>
    %cst_126 = arith.constant 1.000000e+00 : f32
    %361 = vector.broadcast %cst_126 : f32 to vector<1x8xf32>
    %362 = arith.addf %361, %360 : vector<1x8xf32>
    %363 = arith.divf %361, %362 : vector<1x8xf32>
    %c0_127 = arith.constant 0 : index
    %c0_128 = arith.constant 0 : index
    %364 = vector.load %arg7[%c0_127, %c0_128] : memref<1x8xf32, #tpu.memory_space<vmem>>, vector<1x8xf32>
    %365 = arith.mulf %363, %364 : vector<1x8xf32>
    %c0_129 = arith.constant 0 : index
    %c0_130 = arith.constant 0 : index
    %366 = vector.load %arg24[%c0_129, %c0_130] : memref<1x8xf32, #tpu.memory_space<vmem>>, vector<1x8xf32>
    tpu.vector_store %arg24[%c0_129, %c0_130], %365 {strides = array<i32>} : memref<1x8xf32, #tpu.memory_space<vmem>>, vector<1x8xf32>,
    return
  }
  func.func @transform_0(%arg0: i32, %arg1: memref<1xi32, #tpu.memory_space<smem>>) -> (i32, i32) {
    %c0_i32 = arith.constant 0 : i32
    %c0_i32_0 = arith.constant 0 : i32
    %c0_i32_1 = arith.constant 0 : i32
    return %c0_i32, %c0_i32_0 : i32, i32
  }
  func.func @transform_1(%arg0: i32, %arg1: memref<1xi32, #tpu.memory_space<smem>>) -> (i32, i32) {
    %c0_i32 = arith.constant 0 : i32
    %c0_i32_0 = arith.constant 0 : i32
    %c0_i32_1 = arith.constant 0 : i32
    return %c0_i32, %c0_i32_0 : i32, i32
  }
  func.func @transform_2(%arg0: i32, %arg1: memref<1xi32, #tpu.memory_space<smem>>) -> (i32, i32) {
    %c0_i32 = arith.constant 0 : i32
    %c0_i32_0 = arith.constant 0 : i32
    %c0_i32_1 = arith.constant 0 : i32
    return %c0_i32, %c0_i32_0 : i32, i32
  }
  func.func @transform_3(%arg0: i32, %arg1: memref<1xi32, #tpu.memory_space<smem>>) -> (i32, i32) {
    %c0_i32 = arith.constant 0 : i32
    %c0_i32_0 = arith.constant 0 : i32
    %c0_i32_1 = arith.constant 0 : i32
    return %c0_i32, %c0_i32_0 : i32, i32
  }
  func.func @transform_4(%arg0: i32, %arg1: memref<1xi32, #tpu.memory_space<smem>>) -> (i32, i32) {
    %c0_i32 = arith.constant 0 : i32
    %c0_i32_0 = arith.constant 0 : i32
    %c0_i32_1 = arith.constant 0 : i32
    return %c0_i32, %c0_i32_0 : i32, i32
  }
  func.func @transform_5(%arg0: i32, %arg1: memref<1xi32, #tpu.memory_space<smem>>) -> (i32, i32) {
    %c0_i32 = arith.constant 0 : i32
    %c0_i32_0 = arith.constant 0 : i32
    %c0_i32_1 = arith.constant 0 : i32
    return %c0_i32, %c0_i32_0 : i32, i32
  }
  func.func @transform_6(%arg0: i32, %arg1: memref<1xi32, #tpu.memory_space<smem>>) -> (i32, i32) {
    %c0_i32 = arith.constant 0 : i32
    %c0_i32_0 = arith.constant 0 : i32
    %c0_i32_1 = arith.constant 0 : i32
    return %c0_i32, %c0_i32_0 : i32, i32
  }
  func.func @transform_7(%arg0: i32, %arg1: memref<1xi32, #tpu.memory_space<smem>>) -> (i32, i32) {
    %c0_i32 = arith.constant 0 : i32
    %c0_i32_0 = arith.constant 0 : i32
    %c0_i32_1 = arith.constant 0 : i32
    return %c0_i32, %c0_i32_0 : i32, i32
  }
  func.func @transform_8(%arg0: i32, %arg1: memref<1xi32, #tpu.memory_space<smem>>) -> (i32, i32) {
    %c0_i32 = arith.constant 0 : i32
    %c0_i32_0 = arith.constant 0 : i32
    %c0_i32_1 = arith.constant 0 : i32
    return %c0_i32, %c0_i32_0 : i32, i32
  }
  func.func @transform_9(%arg0: i32, %arg1: memref<1xi32, #tpu.memory_space<smem>>) -> (i32, i32) {
    %c0_i32 = arith.constant 0 : i32
    %c0_i32_0 = arith.constant 0 : i32
    %c0_i32_1 = arith.constant 0 : i32
    return %c0_i32, %c0_i32_0 : i32, i32
  }
  func.func @transform_10(%arg0: i32, %arg1: memref<1xi32, #tpu.memory_space<smem>>) -> (i32, i32) {
    %c0_i32 = arith.constant 0 : i32
    %c0_i32_0 = arith.constant 0 : i32
    %c0_i32_1 = arith.constant 0 : i32
    return %c0_i32, %c0_i32_0 : i32, i32
  }
  func.func @transform_11(%arg0: i32, %arg1: memref<1xi32, #tpu.memory_space<smem>>) -> (i32, i32) {
    %c0_i32 = arith.constant 0 : i32
    %c0_i32_0 = arith.constant 0 : i32
    %c0_i32_1 = arith.constant 0 : i32
    return %c0_i32, %c0_i32_0 : i32, i32
  }
  func.func @transform_12(%arg0: i32, %arg1: memref<1xi32, #tpu.memory_space<smem>>) -> (i32, i32) {
    %c0_i32 = arith.constant 0 : i32
    %c0_i32_0 = arith.constant 0 : i32
    %c0_i32_1 = arith.constant 0 : i32
    return %c0_i32, %c0_i32_0 : i32, i32
  }
  func.func @transform_13(%arg0: i32, %arg1: memref<1xi32, #tpu.memory_space<smem>>) -> (i32, i32) {
    %c0_i32 = arith.constant 0 : i32
    %c0_i32_0 = arith.constant 0 : i32
    %c0_i32_1 = arith.constant 0 : i32
    return %c0_i32, %c0_i32_0 : i32, i32
  }
  func.func @transform_14(%arg0: i32, %arg1: memref<1xi32, #tpu.memory_space<smem>>) -> (i32, i32) {
    %c0_i32 = arith.constant 0 : i32
    %c0_i32_0 = arith.constant 0 : i32
    %c0_i32_1 = arith.constant 0 : i32
    return %c0_i32, %c0_i32_0 : i32, i32
  }
  func.func @transform_15(%arg0: i32, %arg1: memref<1xi32, #tpu.memory_space<smem>>) -> (i32, i32) {
    %c0_i32 = arith.constant 0 : i32
    %c0_i32_0 = arith.constant 0 : i32
    %c0_i32_1 = arith.constant 0 : i32
    return %c0_i32, %c0_i32_0 : i32, i32
  }
  func.func @transform_16(%arg0: i32, %arg1: memref<1xi32, #tpu.memory_space<smem>>) -> (i32, i32) {
    %c0_i32 = arith.constant 0 : i32
    %c0_i32_0 = arith.constant 0 : i32
    %c0_i32_1 = arith.constant 0 : i32
    return %c0_i32, %c0_i32_0 : i32, i32
  }
  func.func @transform_17(%arg0: i32, %arg1: memref<1xi32, #tpu.memory_space<smem>>) -> (i32, i32) {
    %c0_i32 = arith.constant 0 : i32
    %c0_i32_0 = arith.constant 0 : i32
    %c0_i32_1 = arith.constant 0 : i32
    return %c0_i32, %c0_i32_0 : i32, i32
  }
  func.func @transform_18(%arg0: i32, %arg1: memref<1xi32, #tpu.memory_space<smem>>) -> (i32, i32) {
    %c0_i32 = arith.constant 0 : i32
    %c0_i32_0 = arith.constant 0 : i32
    %c0_i32_1 = arith.constant 0 : i32
    return %c0_i32, %c0_i32_0 : i32, i32
  }
  func.func @transform_19(%arg0: i32, %arg1: memref<1xi32, #tpu.memory_space<smem>>) -> (i32, i32) {
    %c0_i32 = arith.constant 0 : i32
    %c0_i32_0 = arith.constant 0 : i32
    %c0_i32_1 = arith.constant 0 : i32
    return %c0_i32, %c0_i32_0 : i32, i32
  }
  func.func @transform_20(%arg0: i32, %arg1: memref<1xi32, #tpu.memory_space<smem>>) -> (i32, i32) {
    %c0_i32 = arith.constant 0 : i32
    %c0_i32_0 = arith.constant 0 : i32
    %c0_i32_1 = arith.constant 0 : i32
    return %c0_i32, %c0_i32_0 : i32, i32
  }
  func.func @transform_21(%arg0: i32, %arg1: memref<1xi32, #tpu.memory_space<smem>>) -> (i32, i32) {
    %c0_i32 = arith.constant 0 : i32
    %c0_i32_0 = arith.constant 0 : i32
    %c0_i32_1 = arith.constant 0 : i32
    return %c0_i32, %c0_i32_0 : i32, i32
  }
  func.func @transform_22(%arg0: i32, %arg1: memref<1xi32, #tpu.memory_space<smem>>) -> (i32, i32) {
    %c0_i32 = arith.constant 0 : i32
    %c0_i32_0 = arith.constant 0 : i32
    %c0_i32_1 = arith.constant 0 : i32
    return %c0_i32, %c0_i32_0 : i32, i32
  }
  func.func @transform_23(%arg0: i32, %arg1: memref<1xi32, #tpu.memory_space<smem>>) -> (i32, i32) {
    %c0_i32 = arith.constant 0 : i32
    %c0_i32_0 = arith.constant 0 : i32
    %c0_i32_1 = arith.constant 0 : i32
    return %c0_i32, %c0_i32_0 : i32, i32
  }
}

</mosaic_0001>

<bundles_post_ra>
// kernel: kbcin_forward.1
= control target key start
LH: loop header
LB: loop body
LE: loop exit
PB: predicated region body
PF: predicated region fallthrough
CT: control target
= control target key end

     0   :  { %s4431_s0 = inlined_call_operand.<no memory space> [shape: s32[1], index: 0, kind: input, shape index: {}]   ;;  %s4432_s1 = inlined_call_operand.vmem [shape: f32[8,32], index: 1, kind: input, shape index: {}]   ;;  %s4433_s2 = inlined_call_operand.vmem [shape: f32[8,32], index: 2, kind: input, shape index: {}]   ;;  %s4434_s3 = inlined_call_operand.vmem [shape: f32[48,16], index: 3, kind: input, shape index: {}]   ;;  %s4435_s4 = inlined_call_operand.hbm [shape: f32[8,8], index: 4, kind: input, shape index: {}]   ;;  %s4436_s5 = inlined_call_operand.hbm [shape: f32[8,8], index: 5, kind: input, shape index: {}]   ;;  %s4437_s6 = inlined_call_operand.vmem [shape: f32[1,8], index: 6, kind: input, shape index: {}]   ;;  %s4438_s7 = inlined_call_operand.vmem [shape: f32[16,32], index: 7, kind: input, shape index: {}]   ;;  %s4439_s8 = inlined_call_operand.hbm [shape: f32[1,32], index: 8, kind: input, shape index: {}]   ;;  %s4440_s9 = inlined_call_operand.vmem [shape: f32[32,64], index: 9, kind: input, shape index: {}]   ;;  %s4441_s10 = inlined_call_operand.hbm [shape: f32[2,32], index: 10, kind: input, shape index: {}]   ;;  %s4442_s11 = inlined_call_operand.hbm [shape: f32[2,32], index: 11, kind: input, shape index: {}]   ;;  %s4443_s12 = inlined_call_operand.hbm [shape: f32[32,64], index: 12, kind: input, shape index: {}]   ;;  %s4444_s13 = inlined_call_operand.hbm [shape: f32[1,64], index: 13, kind: input, shape index: {}]   ;;  %s4445_s14 = inlined_call_operand.hbm [shape: f32[32,128], index: 14, kind: input, shape index: {}]   ;;  %s4446_s15 = inlined_call_operand.hbm [shape: f32[1,128], index: 15, kind: input, shape index: {}]   ;;  %s4447_s16 = inlined_call_operand.hbm [shape: f32[32,128], index: 16, kind: input, shape index: {}]   ;;  %s4448_s17 = inlined_call_operand.hbm [shape: f32[1,128], index: 17, kind: input, shape index: {}]   ;;  %s4449_s18 = inlined_call_operand.vmem [shape: f32[64,128], index: 18, kind: input, shape index: {}]   ;;  %s4450_s19 = inlined_call_operand.hbm [shape: f32[2,128], index: 19, kind: input, shape index: {}]   ;;  %s4451_s20 = inlined_call_operand.vmem [shape: f32[96,96], index: 20, kind: input, shape index: {}]   ;;  %s4452_s21 = inlined_call_operand.vmem [shape: f32[96,96], index: 21, kind: input, shape index: {}]   ;;  %s4453_s22 = inlined_call_operand.hbm [shape: f32[1,96], index: 22, kind: input, shape index: {}]   ;;  %s4454_s23 = inlined_call_operand.hbm [shape: f32[1,8], index: 23, kind: output, shape index: {0}]   ;;  %s4455_s24 = inlined_call_operand.vmem [shape: f32[4,8], index: 24, kind: output, shape index: {1}]  }
   0x1   :  { %4459 = sst [smem:[#allocation34_spill]] %s4431_s0 }
   0x2   :  { %4460 = sst [smem:[#allocation35_spill]] %s4432_s1 }
   0x3   :  { %4461 = sst [smem:[#allocation36_spill]] %s4433_s2 }
   0x4   :  { %4462 = sst [smem:[#allocation37_spill]] %s4434_s3 }
   0x5   :  { %4463 = sst [smem:[#allocation38_spill]] %s4435_s4 }
   0x6   :  { %4464 = sst [smem:[#allocation39_spill]] %s4436_s5 }
   0x7   :  { %4465 = sst [smem:[#allocation40_spill]] %s4437_s6 }
   0x8   :  { %4466 = sst [smem:[#allocation41_spill]] %s4438_s7 }
   0x9   :  { %4467 = sst [smem:[#allocation42_spill]] %s4439_s8 }
   0xa   :  { %31 = vsyncpa [#allocation5], 0 }
   0xb   :  { %32 = vsyncpa [#allocation8], 0 }
   0xc   :  { %33 = vsyncpa [#allocation11], 0 }
   0xd   :  { %34 = vsyncpa [#allocation14], 0 }
   0xe   :  { %35 = vsyncpa [#allocation17], 0 }
   0xf   :  { %36 = vsyncpa [#allocation20], 0 }
  0x10   :  { %37 = vsyncpa [#allocation23], 0 }
  0x11   :  { %38 = vsyncpa [#allocation6], 0  ;;  %s3676_s5 = smov [#allocation7]   ;;  %s3677_s27 = smov [#allocation10]  }
  0x12   :  { %s61_s26 = sshll.u32 %s3676_s5, 4  ;;  %s87_s28 = sshll.u32 %s3677_s27, 4  ;;  %s62_s26 = int_to_ptr.vmem [resolvable:$true] %s61_s26  ;;  %s88_s28 = int_to_ptr.vmem [resolvable:$true] %s87_s28 }
  0x13   :  { %s3388_s6 = scalar_lea.vmem %s62_s26, 128  ;;  %p3393_p1 = scmp.lt.s32.totalorder %s62_s26, %s62_s26 }
  0x14   :  { %p3389_p0 = scmp.ne.s32.totalorder %s62_s26, %s3388_s6  ;;  %p3394_p2 = scmp.lt.s32.totalorder %s3388_s6, %s3388_s6 }
  0x16   :  { %p3395_p3 = por %p3394_p2, %p3393_p1 }
  0x18   :  { %p3396_p4 = pnand %p3395_p3, %p3389_p0 }
  0x1a   :  { %3399 = shalt.err (!%p3396_p4)
}
  0x1b   :  { %s4468_s0 = sld [smem:[#allocation39_spill]]  ;;  %s3408_s7 = scalar_lea.vmem %s88_s28, 32 }
  0x1c   :  { %p3409_p5 = scmp.ne.s32.totalorder %s88_s28, %s3408_s7  ;;  %p3413_p6 = scmp.lt.s32.totalorder %s88_s28, %s88_s28 }
  0x1d   :  { %p3414_p7 = scmp.lt.s32.totalorder %s3408_s7, %s3408_s7 }
  0x1f   :  { %p3415_p8 = por %p3414_p7, %p3413_p6 }
  0x21   :  { %64 = dma.hbm_to_vmem [thread:$0]  %s4468_s0, 128, %s62_s26, [#allocation8]  }
  0x22   :  { %p3416_p9 = pnand %p3415_p8, %p3409_p5 }
  0x24   :  { %3419 = shalt.err (!%p3416_p9)
}
  0x25   :  { %90 = dma.hbm_to_vmem [thread:$0]  %s4441_s10, 32, %s88_s28, [#allocation11]  }
  0x26   :  { %s3678_s25 = smov [#allocation13]  }
  0x27   :  { %s106_s8 = sshll.u32 %s3678_s25, 4  ;;  %s107_s8 = int_to_ptr.vmem [resolvable:$true] %s106_s8 }
  0x28   :  { %s3428_s4 = scalar_lea.vmem %s107_s8, 512  ;;  %p3433_p11 = scmp.lt.s32.totalorder %s107_s8, %s107_s8 }
  0x29   :  { %p3429_p10 = scmp.ne.s32.totalorder %s107_s8, %s3428_s4  ;;  %p3434_p12 = scmp.lt.s32.totalorder %s3428_s4, %s3428_s4 }
  0x2b   :  { %p3435_p13 = por %p3434_p12, %p3433_p11 }
  0x2d   :  { %p3436_p0 = pnand %p3435_p13, %p3429_p10 }
  0x2f   :  { %3439 = shalt.err (!%p3436_p0)
}
  0x30   :  { %s3679_s1 = smov 128   ;;  %s3680_s5 = smov 8  }
  0x31   :  { %112 = dma.hbm_to_vmem [thread:$0]  %s4443_s12, 512, %s107_s8, [#allocation14], %s3679_s1, %s3679_s1, %s3680_s5  }
  0x32   :  { %s3681_s6 = smov [#allocation16]   ;;  %s3682_s10 = smov [#allocation19]  }
  0x33   :  { %s128_s2 = sshll.u32 %s3681_s6, 4  ;;  %s150_s28 = sshll.u32 %s3682_s10, 4  ;;  %s129_s2 = int_to_ptr.vmem [resolvable:$true] %s128_s2  ;;  %s151_s28 = int_to_ptr.vmem [resolvable:$true] %s150_s28 }
  0x34   :  { %s3448_s29 = scalar_lea.vmem %s129_s2, 512  ;;  %p3453_p2 = scmp.lt.s32.totalorder %s129_s2, %s129_s2 }
  0x35   :  { %p3449_p1 = scmp.ne.s32.totalorder %s129_s2, %s3448_s29  ;;  %p3454_p3 = scmp.lt.s32.totalorder %s3448_s29, %s3448_s29 }
  0x37   :  { %p3455_p4 = por %p3454_p3, %p3453_p2 }
  0x39   :  { %p3456_p5 = pnand %p3455_p4, %p3449_p1 }
  0x3b   :  { %3459 = shalt.err (!%p3456_p5)
}
  0x3c   :  { %134 = dma.hbm_to_vmem [thread:$0]  %s4445_s14, 512, %s129_s2, [#allocation17], %s3679_s1, %s3679_s1, %s3680_s5  }
  0x3d   :  { %s3468_s30 = scalar_lea.vmem %s151_s28, 512  ;;  %p3473_p7 = scmp.lt.s32.totalorder %s151_s28, %s151_s28 }
  0x3e   :  { %p3469_p6 = scmp.ne.s32.totalorder %s151_s28, %s3468_s30  ;;  %p3474_p8 = scmp.lt.s32.totalorder %s3468_s30, %s3468_s30 }
  0x40   :  { %p3475_p9 = por %p3474_p8, %p3473_p7 }
  0x42   :  { %p3476_p10 = pnand %p3475_p9, %p3469_p6 }
  0x44   :  { %3479 = shalt.err (!%p3476_p10)
}
  0x45   :  { %156 = dma.hbm_to_vmem [thread:$0]  %s4447_s16, 512, %s151_s28, [#allocation20], %s3679_s1, %s3679_s1, %s3680_s5  }
  0x46   :  { %s3683_s25 = smov [#allocation22]   ;;  %s3684_s4 = smov [#allocation4]  }
  0x47   :  { %s175_s8 = sshll.u32 %s3683_s25, 4  ;;  %s51_s26 = sshll.u32 %s3684_s4, 4  ;;  %s176_s8 = int_to_ptr.vmem [resolvable:$true] %s175_s8  ;;  %s52_s26 = int_to_ptr.vmem [resolvable:$true] %s51_s26 }
  0x48   :  { %s3488_s27 = scalar_lea.vmem %s176_s8, 32  ;;  %p3493_p12 = scmp.lt.s32.totalorder %s176_s8, %s176_s8 }
  0x49   :  { %p3489_p11 = scmp.ne.s32.totalorder %s176_s8, %s3488_s27  ;;  %p3494_p13 = scmp.lt.s32.totalorder %s3488_s27, %s3488_s27 }
  0x4b   :  { %p3495_p0 = por %p3494_p13, %p3493_p12 }
  0x4d   :  { %p3496_p1 = pnand %p3495_p0, %p3489_p11 }
  0x4f   :  { %3499 = shalt.err (!%p3496_p1)
}
  0x50   :  { %178 = dma.hbm_to_vmem [thread:$0]  %s4450_s19, 32, %s176_s8, [#allocation23]  }
  0x51   :  { %s3508_s2 = scalar_lea.vmem %s52_s26, 128  ;;  %p3513_p3 = scmp.lt.s32.totalorder %s52_s26, %s52_s26 }
  0x52   :  { %p3509_p2 = scmp.ne.s32.totalorder %s52_s26, %s3508_s2  ;;  %p3514_p4 = scmp.lt.s32.totalorder %s3508_s2, %s3508_s2 }
  0x54   :  { %p3515_p5 = por %p3514_p4, %p3513_p3 }
  0x56   :  { %p3516_p6 = pnand %p3515_p5, %p3509_p2 }
  0x58   :  { %3519 = shalt.err (!%p3516_p6)
}
  0x59   :  { %s4469_s5 = sld [smem:[#allocation38_spill]]  ;;  %s3685_s10 = smov [#allocation9]  }
  0x5a   :  { %s75_s28 = sshll.u32 %s3685_s10, 4  ;;  %s3686_s29 = smov [#allocation12]   ;;  %s76_s28 = int_to_ptr.vmem [resolvable:$true] %s75_s28 }
  0x5b   :  { %s97_s0 = sshll.u32 %s3686_s29, 4  ;;  %s3528_s7 = scalar_lea.vmem %s76_s28, 16  ;;  %s98_s0 = int_to_ptr.vmem [resolvable:$true] %s97_s0 }
  0x5c   :  { %p3529_p7 = scmp.ne.s32.totalorder %s76_s28, %s3528_s7  ;;  %s3532_s19 = scalar_lea.vmem %s76_s28, 32 }
  0x5d   :  { %p3533_p8 = scmp.lt.s32.totalorder %s76_s28, %s76_s28  ;;  %p3534_p9 = scmp.lt.s32.totalorder %s3532_s19, %s3528_s7 }
  0x5f   :  { %54 = dma.hbm_to_vmem [thread:$0]  %s4469_s5, 128, %s52_s26, [#allocation5]  }
  0x60   :  { %p3535_p10 = por %p3534_p9, %p3533_p8 }
  0x62   :  { %p3536_p11 = pnand %p3535_p10, %p3529_p7 }
  0x64   :  { %3539 = shalt.err (!%p3536_p11)
}
  0x65   :  { %s4470_s3 = sld [smem:[#allocation42_spill]]  ;;  %s3548_s25 = scalar_lea.vmem %s98_s0, 32 }
  0x66   :  { %p3549_p12 = scmp.ne.s32.totalorder %s98_s0, %s3548_s25  ;;  %p3553_p13 = scmp.lt.s32.totalorder %s98_s0, %s98_s0 }
  0x67   :  { %p3554_p0 = scmp.lt.s32.totalorder %s3548_s25, %s3548_s25 }
  0x69   :  { %p3555_p1 = por %p3554_p0, %p3553_p13 }
  0x6b   :  { %78 = dma.hbm_to_vmem [thread:$0]  %s4470_s3, 16, %s76_s28, [#allocation8]  }
  0x6c   :  { %p3556_p2 = pnand %p3555_p1, %p3549_p12 }
  0x6e   :  { %3559 = shalt.err (!%p3556_p2)
}
  0x6f   :  { %100 = dma.hbm_to_vmem [thread:$0]  %s4442_s11, 32, %s98_s0, [#allocation11]  }
  0x70   :  { %s3687_s26 = smov [#allocation15]   ;;  %s3688_s14 = smov [#allocation18]  }
  0x71   :  { %s119_s27 = sshll.u32 %s3687_s26, 4  ;;  %s141_s6 = sshll.u32 %s3688_s14, 4  ;;  %s120_s27 = int_to_ptr.vmem [resolvable:$true] %s119_s27  ;;  %s142_s6 = int_to_ptr.vmem [resolvable:$true] %s141_s6 }
  0x72   :  { %s3568_s2 = scalar_lea.vmem %s120_s27, 16  ;;  %s3572_s16 = scalar_lea.vmem %s120_s27, 32 }
  0x73   :  { %p3569_p3 = scmp.ne.s32.totalorder %s120_s27, %s3568_s2  ;;  %p3573_p4 = scmp.lt.s32.totalorder %s120_s27, %s120_s27 }
  0x74   :  { %p3574_p5 = scmp.lt.s32.totalorder %s3572_s16, %s3568_s2 }
  0x76   :  { %p3575_p6 = por %p3574_p5, %p3573_p4 }
  0x78   :  { %p3576_p7 = pnand %p3575_p6, %p3569_p3 }
  0x7a   :  { %3579 = shalt.err (!%p3576_p7)
}
  0x7b   :  { %122 = dma.hbm_to_vmem [thread:$0]  %s4444_s13, 16, %s120_s27, [#allocation14]  }
  0x7c   :  { %s3588_s10 = scalar_lea.vmem %s142_s6, 16  ;;  %s3592_s11 = scalar_lea.vmem %s142_s6, 32 }
  0x7d   :  { %p3589_p8 = scmp.ne.s32.totalorder %s142_s6, %s3588_s10  ;;  %p3593_p9 = scmp.lt.s32.totalorder %s142_s6, %s142_s6 }
  0x7e   :  { %p3594_p10 = scmp.lt.s32.totalorder %s3592_s11, %s3588_s10 }
  0x80   :  { %p3595_p11 = por %p3594_p10, %p3593_p9 }
  0x82   :  { %p3596_p12 = pnand %p3595_p11, %p3589_p8 }
  0x84   :  { %3599 = shalt.err (!%p3596_p12)
}
  0x85   :  { %144 = dma.hbm_to_vmem [thread:$0]  %s4446_s15, 16, %s142_s6, [#allocation17]  }
  0x86   :  { %s3689_s0 = smov [#allocation21]   ;;  %s3690_s19 = smov [#allocation24]  }
  0x87   :  { %s163_s7 = sshll.u32 %s3689_s0, 4  ;;  %s189_s30 = sshll.u32 %s3690_s19, 4  ;;  %s164_s7 = int_to_ptr.vmem [resolvable:$true] %s163_s7  ;;  %s190_s30 = int_to_ptr.vmem [resolvable:$true] %s189_s30 }
  0x88   :  { %s3608_s12 = scalar_lea.vmem %s164_s7, 16  ;;  %s3612_s13 = scalar_lea.vmem %s164_s7, 32 }
  0x89   :  { %p3609_p13 = scmp.ne.s32.totalorder %s164_s7, %s3608_s12  ;;  %p3613_p0 = scmp.lt.s32.totalorder %s164_s7, %s164_s7 }
  0x8a   :  { %p3614_p1 = scmp.lt.s32.totalorder %s3612_s13, %s3608_s12 }
  0x8c   :  { %p3615_p2 = por %p3614_p1, %p3613_p0 }
  0x8e   :  { %p3616_p3 = pnand %p3615_p2, %p3609_p13 }
  0x90   :  { %3619 = shalt.err (!%p3616_p3)
}
  0x91   :  { %166 = dma.hbm_to_vmem [thread:$0]  %s4448_s17, 16, %s164_s7, [#allocation20]  }
  0x92   :  { %s3628_s8 = scalar_lea.vmem %s190_s30, 16  ;;  %s3632_s15 = scalar_lea.vmem %s190_s30, 32 }
  0x93   :  { %p3629_p4 = scmp.ne.s32.totalorder %s190_s30, %s3628_s8  ;;  %p3633_p5 = scmp.lt.s32.totalorder %s190_s30, %s190_s30 }
  0x94   :  { %p3634_p6 = scmp.lt.s32.totalorder %s3632_s15, %s3628_s8 }
  0x96   :  { %p3635_p7 = por %p3634_p6, %p3633_p5 }
  0x98   :  { %p3636_p8 = pnand %p3635_p7, %p3629_p4 }
  0x9a   :  { %3639 = shalt.err (!%p3636_p8)
}
  0x9b   :  { %192 = dma.hbm_to_vmem [thread:$0]  %s4453_s22, 16, %s190_s30, [#allocation23]  }
  0x9c   :  { %3660 = dma.done.wait [#allocation5], 128  }
  0x9d   :  { %3661 = vsyncadd [#allocation5], 4294967168 }
  0x9e   :  { %3662 = dma.done.wait [#allocation8], 144  }
  0x9f   :  { %3663 = vsyncadd [#allocation8], 4294967152 }
  0xa0   :  { %3664 = dma.done.wait [#allocation11], 64  }
  0xa1   :  { %3665 = vsyncadd [#allocation11], 4294967232 }
  0xa2   :  { %3666 = dma.done.wait [#allocation14], 528  }
  0xa3   :  { %3667 = vsyncadd [#allocation14], 4294966768 }
  0xa4   :  { %3668 = dma.done.wait [#allocation17], 528  }
  0xa5   :  { %3669 = vsyncadd [#allocation17], 4294966768 }
  0xa6   :  { %3670 = dma.done.wait [#allocation20], 528  }
  0xa7   :  { %3671 = vsyncadd [#allocation20], 4294966768 }
  0xa8   :  { %3672 = dma.done.wait [#allocation23], 48  }
  0xa9   :  { %3673 = vsyncadd [#allocation23], 4294967248  ;;  %s4471_s14 = sld [smem:[#allocation34_spill]]  ;;  %v238_v0 = vlaneseq  ;;  %v3691_v1 = vmov 0.0   ;;  %vm3692_vm0 = vmmov 0   ;;  %vm244_vm2 = vcmask 64512  }
  0xaa   :  { %3092 = vmatprep.subr.mxu0 %v3691_v1  ;;  %3094 = vmatprep.mubr.msk.f32.mxu0 %vm3692_vm0, %v3691_v1  ;;  %s4472_s16 = sld [smem:[#allocation35_spill]]  ;;  %v3881_v7 = vld [vmem:[#allocation7] sm:$0xff]  ;;  %v3888_v8 = vld [vmem:[#allocation4] sm:$0xff]  ;;  %v691_v9 = vld [vmem:[%s4440_s9 + $0x18] sm:$0xff]  ;;  %vm568_vm3 = vcmask 130048   ;;  %vm692_vm4 = vcmask 261120  }
  0xab   :  { %v3868_v3 = vand.u32 127, %v238_v0  ;;  %3107 = vmatprep.subr.mxu1 %v3691_v1  ;;  %3109 = vmatprep.mubr.msk.f32.mxu1 %vm3692_vm0, %v3691_v1  ;;  %s4473_s10 = sld [smem:[#allocation36_spill]]  ;;  %v690_v11 = vld [vmem:[%s4440_s9 + $0x10] sm:$0xff]  ;;  %v689_v14 = vld [vmem:[%s4440_s9 + $0x8] sm:$0xff]  ;;  %v688_v16 = vld [vmem:[%s4440_s9] sm:$0xff]  ;;  %v3995_v63 = vshrl.u32 %v238_v0, 7 }
  0xac   :  { %3108 = vmatpush3.msra.mxu1 %v3881_v7  ;;  %s4474_s7 = sld [smem:[#allocation41_spill]]  ;;  %v3946_v21 = vld [vmem:[#allocation16 + $0x18] sm:$0xff]  ;;  %v3950_v22 = vld [vmem:[#allocation16 + $0x10] sm:$0xff]  ;;  %v3956_v23 = vld [vmem:[#allocation16 + $0x8] sm:$0xff]  ;;  %s3693_s28 = smov 32   ;;  %vm1555_vm9 = vcmask 57344  }
  0xad   :  { %3125 = vmatprep.subr.mxu1 %v3691_v1  ;;  %s4475_s3 = sld [smem:[#allocation37_spill]]  ;;  %v3960_v24 = vld [vmem:[#allocation16] sm:$0xff]  ;;  %v769_v26 = vld [vmem:[#allocation13 + $0x18] sm:$0xff]  ;;  %v768_v27 = vld [vmem:[#allocation13 + $0x10] sm:$0xff]  ;;  %s3694_s29 = smov 96   ;;  %vm530_vm10 = vcmp.eq.s32.totalorder %v3995_v63, %v3868_v3  ;;  %vm2741_vm11 = vcmask 785408  }
  0xae   :  { %v1013_v25 = vld [vmem:[#allocation19 + $0x18] sm:$0xff]  ;;  %v767_v28 = vld [vmem:[#allocation13 + $0x8] sm:$0xff]  ;;  %v1012_v37 = vld [vmem:[#allocation19 + $0x10] sm:$0xff]  ;;  %s3695_s8 = smov 64   ;;  %s3696_s9 = smov [#allocation25]  }
  0xaf   :  { %s2927_s6 = sadd.s32 4294967295, %s4471_s14  ;;  %v766_v29 = vld [vmem:[#allocation13] sm:$0xff]  ;;  %v1011_v39 = vld [vmem:[#allocation19 + $0x8] sm:$0xff]  ;;  %v2934_v42 = vld [vmem:[#allocation9] ss:$0 sm:$0xff]  ;;  %s2908_s5 = sshll.u32 %s3696_s9, 4  ;;  %s2909_s5 = int_to_ptr.vmem [resolvable:$true] %s2908_s5 }
  0xb0   :  { %v240_v2 = vstv %s2927_s6  ;;  %v232_v5 = vld [vmem:[%s4472_s16] sm:$0xff]  ;;  %v2947_v0 = vld [vmem:[#allocation21] ss:$0 sm:$0xff]  ;;  %p3645_p10 = scmp.lt.s32.totalorder %s2909_s5, %s2909_s5 }
  0xb1   :  { %vm241_vm1 = vcmp.eq.s32.totalorder %v3868_v3, %v240_v2  ;;  %v233_v6 = vld [vmem:[%s4473_s10] sm:$0xff]  ;;  %3093 = vmatpush3.msra.mxu0 %v232_v5  ;;  %v3998_v2 = vsub.s32 0, %v3995_v63  ;;  %s3640_s10 = scalar_lea.vmem %s2909_s5, 16 }
  0xb2   :  { %v2928_v4 = vsel %vm241_vm1, 1.0, %v3691_v1  ;;  %3097 = vmatprep.subr.mxu0 %v3691_v1  ;;  %v560_v10 = vld [vmem:[%s4474_s7 + $0x8] sm:$0xff]  ;;  %v559_v13 = vld [vmem:[%s4474_s7] sm:$0xff]  ;;  %p3641_p9 = scmp.ne.s32.totalorder %s2909_s5, %s3640_s10 }
  0xb3   :  { %3095 = vmatmul.mubr.msk.f32.vlgmr.msra.gmra.mxu0 %vm244_vm2, %v2928_v4  ;;  %3110 = vmatmul.mubr.msk.f32.vlgmr.msra.gmra.mxu1 %vm244_vm2, %v2928_v4  ;;  %v553_v12 = vld [vmem:[%s4475_s3] sm:$0xff]  ;;  %v554_v15 = vld [vmem:[%s4475_s3 + $0x8] sm:$0xff]  ;;  %v555_v17 = vld [vmem:[%s4475_s3 + $0x10] sm:$0xff] }
  0xb4   :  { %3098 = vmatpush3.msra.mxu0 %v233_v6  ;;  %3099 = vmatprep.mubr.msk.f32.mxu0 %vm3692_vm0, %v3691_v1  ;;  %v556_v18 = vld [vmem:[%s4475_s3 + $0x18] sm:$0xff]  ;;  %v557_v19 = vld [vmem:[%s4475_s3 + $0x20] sm:$0xff]  ;;  %v558_v20 = vld [vmem:[%s4475_s3 + $0x28] sm:$0xff] }
  0xb5   :  { %3102 = vmatprep.subr.mxu0 %v3691_v1  ;;  %3126 = vmatpush3.msra.mxu1 %v691_v9  ;;  %v1010_v41 = vld [vmem:[#allocation19] sm:$0xff] }
  0xb6   :  { %3127 = vmatprep.subr.mxu1 %v3691_v1  ;;  %3133 = vmatprep.mubr.msk.f32.mxu1 %vm3692_vm0, %v3691_v1 }
  0xb7   :  { %3100 = vmatmul.mubr.msk.f32.vlgmr.msra.gmra.mxu0 %vm244_vm2, %v2928_v4  ;;  %3128 = vmatpush3.msra.mxu1 %v690_v11 }
  0xb8   :  { %3103 = vmatpush3.msra.mxu0 %v3888_v8  ;;  %3104 = vmatprep.mubr.msk.f32.mxu0 %vm3692_vm0, %v3691_v1 }
  0xb9   :  { %3112 = vmatprep.subr.mxu0 %v560_v10  ;;  %3129 = vmatprep.subr.mxu1 %v3691_v1 }
  0xba   :  { %3130 = vmatpush3.msra.mxu1 %v689_v14 }
  0xbb   :  { %3105 = vmatmul.mubr.msk.f32.vlgmr.msra.gmra.mxu0 %vm244_vm2, %v2928_v4  ;;  %3131 = vmatprep.subr.mxu1 %v3691_v1  ;;  %v4000_v4 = vld [vmem:[#allocation10] sm:$0x3] }
  0xbc   :  { %3113 = vmatpush3.msra.mxu0 %v560_v10  ;;  %3116 = vmatprep.mubr.msk.f32.mxu0 %vm568_vm3, %v553_v12  ;;  %v863_v10 = vld [vmem:[#allocation18] sm:$0x1] }
  0xbd   :  { %3114 = vmatprep.subr.mxu0 %v559_v13  ;;  %3132 = vmatpush3.msra.mxu1 %v688_v16 }
  0xbe   :  { %3115 = vmatpush3.msra.mxu0 %v559_v13  ;;  %3147 = vmatprep.subr.mxu1 %v3691_v1 }
  0xbf   :  { %3117 = vmatmul.mubr.msk.f32.vlgmr.msra.gmra.mxu0 %vm568_vm3, %v554_v15  ;;  %3134 = vmatmul.mubr.msk.f32.vlgmr.msra.gmra.mxu1 %vm692_vm4, %v232_v5  ;;  %v1134_v5 = vrot.slane %v4000_v4, %v3998_v2 }
  0xc0   :  { %3119 = vmatprep.mubr.msk.f32.mxu0 %vm568_vm3, %v555_v17  ;;  %3148 = vmatpush3.msra.mxu1 %v3946_v21 }
  0xc1   :  { %3155 = vmatprep.mubr.msk.f32.mxu1 %vm3692_vm0, %v3691_v1  ;;  %3149 = vmatprep.subr.mxu1 %v3691_v1 }
  0xc2   :  { %3150 = vmatpush3.msra.mxu1 %v3950_v22  ;;  %3136 = vmatprep.subr.mxu0 %v769_v26 }
  0xc3   :  { %3120 = vmatmul.mubr.msk.f32.gmra.mxu0 %vm568_vm3, %v556_v18  ;;  %3151 = vmatprep.subr.mxu1 %v3691_v1 }
  0xc4   :  { %3122 = vmatprep.mubr.msk.f32.mxu0 %vm568_vm3, %v557_v19  ;;  %3152 = vmatpush3.msra.mxu1 %v3956_v23 }
  0xc5   :  { %3153 = vmatprep.subr.mxu1 %v3691_v1  ;;  %3137 = vmatpush3.msra.mxu0 %v769_v26 }
  0xc6   :  { %3154 = vmatpush3.msra.mxu1 %v3960_v24  ;;  %3138 = vmatprep.subr.mxu0 %v768_v27 }
  0xc7   :  { %3123 = vmatmul.mubr.msk.f32.gmra.mxu0 %vm568_vm3, %v558_v20  ;;  %3169 = vmatprep.subr.mxu1 %v1013_v25  ;;  %v2942_v20 = vld [vmem:[#allocation15] ss:$0 sm:$0xff] }
  0xc8   :  { %3139 = vmatpush3.msra.mxu0 %v768_v27  ;;  %v4016_v27 = vld [vmem:[#allocation12] sm:$0x3] }
  0xc9   :  { %3140 = vmatprep.subr.mxu0 %v767_v28 }
  0xca   :  { %3141 = vmatpush3.msra.mxu0 %v767_v28 }
  0xcb   :  { %3142 = vmatprep.subr.mxu0 %v766_v29 }
  0xcc   :  { %3143 = vmatpush3.msra.mxu0 %v766_v29 }
  0xcd   :  { %3158 = vmatprep.subr.mxu0 %v3691_v1 }
 0x173   :  { %v314_v30 = vpop.f32.mrf.mxu0  ;;  %v3965_v32 = vpop.f32.mrf.mxu1 }
 0x175   :  { %v3096_v31 = vpop.f32.mrf.mxu0  ;;  %v3111_v35 = vpop.f32.mrf.mxu1 }
 0x177   :  { %v384_v33 = vpop.f32.mrf.mxu0 }
 0x178   :  { %v858_v34 = vadd.f32 %v384_v33, %v314_v30 }
 0x179   :  { %v3101_v36 = vpop.f32.mrf.mxu0 }
 0x17a   :  { %3156 = vmatmul.mubr.msk.f32.vlgmr.msra.gmra.mxu1 %vm692_vm4, %v858_v34 }
 0x17b   :  { %v3968_v38 = vpop.f32.mrf.mxu0  ;;  %3170 = vmatpush3.msra.mxu1 %v1013_v25 }
 0x17c   :  { %3171 = vmatprep.subr.mxu1 %v1012_v37 }
 0x17d   :  { %v3106_v40 = vpop.f32.mrf.mxu0  ;;  %3172 = vmatpush3.msra.mxu1 %v1012_v37  ;;  %v4028_v37 = vadd.f32 %v3881_v7, %v3888_v8 }
 0x17e   :  { %3173 = vmatprep.subr.mxu1 %v1011_v39 }
 0x17f   :  { %v3118_v43 = vpop.f32.mrf.mxu0  ;;  %3174 = vmatpush3.msra.mxu1 %v1011_v39  ;;  %v3992_v61 = vpop.f32.mrf.mxu1  ;;  %vm552_vm6 = vcmp.eq.f32.partialorder %v4028_v37, 0.0 }
 0x180   :  { %3175 = vmatprep.subr.mxu1 %v1010_v41  ;;  %v659_v44 = vadd.f32 %v3118_v43, %v2934_v42  ;;  %v1135_v6 = vmul.f32 %v1134_v5, %v3992_v61 }
 0x181   :  { %v653_v45 = vpop.f32.mrf.mxu0  ;;  %3176 = vmatpush3.msra.mxu1 %v1010_v41  ;;  %v3135_v62 = vpop.f32.mrf.mxu1 }
 0x182   :  { %v654_v46 = vadd.f32 %v2934_v42, %v653_v45  ;;  %3193 = vmatprep.subr.mxu1 %v3691_v1  ;;  %v683_v49 = vmax.f32 %v659_v44, 0.0  ;;  %v1136_v9 = vsel %vm692_vm4, %v1135_v6, 0.0  ;;  %v1120_v62 = vld [vmem:[%s4449_s18] sm:$0xff] }
 0x183   :  { %v3121_v47 = vpop.f32.mrf.mxu0  ;;  %1137 = vadd.xlane.f32.xlu0 %v1136_v9 }
 0x184   :  { %v682_v48 = vmax.f32 %v654_v46, 0.0  ;;  %v669_v50 = vadd.f32 %v3121_v47, %v2934_v42 }
 0x185   :  { %v663_v51 = vpop.f32.mrf.mxu0 }
 0x186   :  { %v664_v52 = vadd.f32 %v2934_v42, %v663_v51  ;;  %3177 = vmatprep.mubr.msk.f32.mxu1 %vm692_vm4, %v682_v48  ;;  %v685_v55 = vmax.f32 %v669_v50, 0.0 }
 0x187   :  { %v3124_v53 = vpop.f32.mrf.mxu0  ;;  %3178 = vmatmul.mubr.msk.f32.vlgmr.msra.gmra.mxu1 %vm692_vm4, %v683_v49 }
 0x188   :  { %v684_v54 = vmax.f32 %v664_v52, 0.0  ;;  %v679_v56 = vadd.f32 %v3124_v53, %v2934_v42  ;;  %v1817_v53 = vsub.s32 1, %v3995_v63 }
 0x189   :  { %v673_v57 = vpop.f32.mrf.mxu0 }
 0x18a   :  { %v674_v58 = vadd.f32 %v2934_v42, %v673_v57  ;;  %3180 = vmatprep.mubr.msk.f32.mxu1 %vm692_vm4, %v684_v54  ;;  %v687_v60 = vmax.f32 %v679_v56, 0.0  ;;  %v1818_v54 = vrot.slane %v4000_v4, %v1817_v53  ;;  %v1122_v56 = vld [vmem:[%s4449_s18 + $0x10] sm:$0xff]  ;;  %v1121_v57 = vld [vmem:[%s4449_s18 + $0x8] sm:$0xff] }
 0x18b   :  { %3181 = vmatmul.mubr.msk.f32.gmra.mxu1 %vm692_vm4, %v685_v55  ;;  %v1123_v55 = vld [vmem:[%s4449_s18 + $0x18] sm:$0xff] }
 0x18c   :  { %v686_v59 = vmax.f32 %v674_v58, 0.0  ;;  %3201 = vmatprep.mubr.msk.f32.mxu1 %vm3692_vm0, %v3691_v1  ;;  %3194 = vmatpush3.msra.mxu1 %v1123_v55 }
 0x18d   :  { %3195 = vmatprep.subr.mxu1 %v3691_v1 }
 0x18e   :  { %3144 = vmatprep.mubr.msk.f32.mxu0 %vm692_vm4, %v686_v59  ;;  %3196 = vmatpush3.msra.mxu1 %v1122_v56 }
 0x18f   :  { %3145 = vmatmul.mubr.msk.f32.vlgmr.msra.gmra.mxu0 %vm692_vm4, %v687_v60  ;;  %3197 = vmatprep.subr.mxu1 %v3691_v1 }
 0x190   :  { %3159 = vmatpush3.msra.mxu0 %v3946_v21  ;;  %3166 = vmatprep.mubr.msk.f32.mxu0 %vm3692_vm0, %v3691_v1 }
 0x191   :  { %3160 = vmatprep.subr.mxu0 %v3691_v1  ;;  %3198 = vmatpush3.msra.mxu1 %v1121_v57 }
 0x192   :  { %3161 = vmatpush3.msra.mxu0 %v3950_v22  ;;  %3199 = vmatprep.subr.mxu1 %v3691_v1 }
 0x193   :  { %3162 = vmatprep.subr.mxu0 %v3691_v1  ;;  %3200 = vmatpush3.msra.mxu1 %v1120_v62 }
 0x194   :  { %3163 = vmatpush3.msra.mxu0 %v3956_v23  ;;  %3209 = vmatprep.subr.mxu1 %v3691_v1 }
 0x195   :  { %3164 = vmatprep.subr.mxu0 %v3691_v1 }
 0x196   :  { %3165 = vmatpush3.msra.mxu0 %v3960_v24 }
 0x197   :  { %3167 = vmatmul.mubr.msk.f32.vlgmr.msra.gmra.mxu0 %vm692_vm4, %v314_v30  ;;  %3183 = vmatprep.subr.mxu0 %v3691_v1 }
 0x198   :  { %3185 = vmatprep.mubr.msk.f32.mxu0 %vm3692_vm0, %v3691_v1 }
 0x20c   :  { %v1138_v33 = vpop.xlane.xlu0 %1137 }
 0x23a   :  { %v933_v11 = vpop.f32.mrf.mxu1 }
 0x23b   :  { %v4006_v12 = vadd.f32 %v933_v11, %v863_v10 }
 0x23c   :  { %v3157_v13 = vpop.f32.mrf.mxu1 }
 0x247   :  { %v3179_v14 = vpop.f32.mrf.mxu1 }
 0x248   :  { %v4008_v15 = vadd.f32 %v3179_v14, %v2947_v0 }
 0x249   :  { %v1099_v16 = vpop.f32.mrf.mxu1 }
 0x24a   :  { %v4010_v17 = vadd.f32 %v2947_v0, %v1099_v16 }
 0x24b   :  { %v3182_v18 = vpop.f32.mrf.mxu1 }
 0x24c   :  { %v4012_v19 = vadd.f32 %v3182_v18, %v2947_v0 }
 0x24d   :  { %v1109_v50 = vpop.f32.mrf.mxu1 }
 0x24e   :  { %v4037_v51 = vadd.f32 %v2947_v0, %v1109_v50 }
 0x24f   :  { %v3146_v21 = vpop.f32.mrf.mxu0 }
 0x250   :  { %v855_v22 = vadd.f32 %v3146_v21, %v2942_v20 }
 0x251   :  { %v849_v23 = vpop.f32.mrf.mxu0 }
 0x252   :  { %v1129_v24 = vadd.f32 %v855_v22, %v3992_v61  ;;  %v850_v25 = vadd.f32 %v2942_v20, %v849_v23 }
 0x254   :  { %v1130_v26 = vadd.f32 %v1129_v24, %v850_v25  ;;  %v1831_v25 = vrot.slane %v4016_v27, 1 }
 0x256   :  { %3184 = vmatpush3.xpose.msk.msra.mxu0 %vm692_vm4, %v1130_v26 }
 0x257   :  { %v1006_v28 = vpop.f32.mrf.mxu0  ;;  %3188 = vmatprep.subr.mxu0 %v3691_v1 }
 0x258   :  { %v4041_v52 = vadd.f32 %v1006_v28, %v863_v10  ;;  %v4078_v10 = vld [vmem:[#allocation22] sm:$0x3] }
 0x259   :  { %v3168_v29 = vpop.f32.mrf.mxu0  ;;  %3186 = vmatmul.mubr.msk.f32.vlgmr.msra.gmra.mxu0 %vm692_vm4, %v4016_v27  ;;  %v1314_v11 = vrot.slane %v4078_v10, %v3998_v2 }
 0x25a   :  { %3189 = vmatpush3.msra.mxu0 %v3992_v61  ;;  %3190 = vmatprep.mubr.msk.f32.mxu0 %vm3692_vm0, %v3691_v1 }
 0x25b   :  { %3204 = vmatprep.subr.mxu0 %v3691_v1 }
 0x319   :  { %v1211_v30 = vpop.f32.mrf.mxu0 }
 0x31a   :  { %v1218_v31 = vrot.slane %v1211_v30, %v3998_v2 }
 0x31b   :  { %v3187_v34 = vpop.f32.mrf.mxu0 }
 0x31c   :  { %v1219_v35 = vadd.f32 %v1218_v31, %v1138_v33 }
 0x31e   :  { %vm1220_vm5 = vcmp.ge.f32.partialorder %v1219_v35, 0.0  ;;  %v1221_v36 = vmul.f32 0.01, %v1219_v35 }
 0x320   :  { %v1222_v39 = vsel %vm1220_vm5, %v1219_v35, %v1221_v36 }
 0x321   :  { %v1223_v40 = vmul.f32 %v1222_v39, %v3888_v8  ;;  %v1224_v41 = vmul.f32 %v1222_v39, %v3881_v7 }
 0x323   :  { %v1225_v42 = vadd.f32 %v1224_v41, %v1223_v40 }
 0x325   :  { %v1226_v43 = vsel %vm552_vm6, -1e+09, %v1225_v42 }
 0x326   :  { %v1227_v44 = vsel %vm244_vm2, %v1226_v43, -inf }
 0x327   :  { %1228 = vmax.xlane.f32.xlu0 %v1227_v44 }
 0x3b0   :  { %v1229_v45 = vpop.xlane.xlu0 %1228 }
 0x3b1   :  { %v1230_v46 = vsub.f32 %v1226_v43, %v1229_v45 }
 0x3b3   :  { %v1231_v47 = vmul.f32 1.442695, %v1230_v46 }
 0x3b5   :  { %3351 = vpow2.f32 %v1231_v47 }
 0x3c2   :  { %v3352_v48 = vpop.eup %3351 }
 0x3c3   :  { %v1233_v49 = vsel %vm244_vm2, %v3352_v48, 0.0 }
 0x3c4   :  { %1234 = vadd.xlane.f32.xlu1 %v1233_v49 }
 0x3d5   :  { %1592 = vrot.lane.b32.xlu1 %v4037_v51, %s3693_s28 }
 0x3d9   :  { %1610 = vrot.lane.b32.xlu1 %v4041_v52, %s3694_s29 }
 0x3dd   :  { %1832 = vrot.lane.b32.xlu1 %v1130_v26, %s3694_s29 }
 0x3e1   :  { %1820 = vrot.lane.b32.xlu1 %v1818_v54, %s3693_s28 }
 0x44d   :  { %v1235_v58 = vpop.xlane.xlu1 %1234 }
 0x44e   :  { %3353 = vrcp.f32 %v1235_v58 }
 0x451   :  { %v1593_v6 = vpop.permute.xlu1 %1592 }
 0x455   :  { %v4076_v9 = vpop.permute.xlu1 %1610 }
 0x459   :  { %v1833_v13 = vpop.permute.xlu1 %1832 }
 0x45b   :  { %v3354_v59 = vpop.eup %3353 }
 0x45c   :  { %v1237_v60 = vmul.f32 %v3354_v59, %v3352_v48 }
 0x45d   :  { %v1821_v22 = vpop.permute.xlu1 %1820 }
 0x45e   :  { %3191 = vmatmul.mubr.msk.f32.vlgmr.msra.gmra.mxu0 %vm244_vm2, %v1237_v60  ;;  %v1823_v23 = vmul.f32 %v1821_v22, %v3992_v61 }
 0x45f   :  { %3206 = vmatprep.mubr.msk.f32.mxu0 %vm3692_vm0, %v3691_v1 }
 0x51e   :  { %v4070_v4 = vpop.f32.mrf.mxu0 }
 0x51f   :  { %3202 = vmatmul.mubr.msk.f32.vlgmr.msra.gmra.mxu1 %vm692_vm4, %v4070_v4 }
 0x520   :  { %v3192_v5 = vpop.f32.mrf.mxu0  ;;  %3211 = vmatprep.mubr.msk.f32.mxu1 %vm3692_vm0, %v3691_v1 }
 0x5df   :  { %v1384_v0 = vpop.f32.mrf.mxu1 }
 0x5e0   :  { %v4082_v14 = vadd.f32 %v1384_v0, %v1314_v11  ;;  %v1125_v0 = vld [vmem:[%s4449_s18 + $0x28] sm:$0xff] }
 0x5e1   :  { %v3203_v16 = vpop.f32.mrf.mxu1 }
 0x5e2   :  { %v1394_v18 = vadd.f32 %v4082_v14, %v4008_v15  ;;  %v1595_v20 = vadd.f32 %v1593_v6, %v4082_v14  ;;  %v1388_v21 = vadd.f32 %v4082_v14, %v4010_v17  ;;  %v1124_v16 = vld [vmem:[%s4449_s18 + $0x20] sm:$0xff] }
 0x5e4   :  { %3210 = vmatpush3.xpose.msk.msra.mxu1 %vm692_vm4, %v1394_v18  ;;  %1613 = vrot.lane.b32.xlu0 %v1595_v20, %s3695_s8 }
 0x5e5   :  { %3205 = vmatpush3.xpose.msk.msra.mxu0 %vm692_vm4, %v1388_v21  ;;  %3219 = vmatprep.subr.mxu1 %v3691_v1 }
 0x5e6   :  { %3214 = vmatprep.subr.mxu0 %v3691_v1 }
 0x5e7   :  { %3212 = vmatmul.mubr.msk.f32.vlgmr.msra.gmra.mxu1 %vm692_vm4, %v4006_v12 }
 0x5e8   :  { %3207 = vmatmul.mubr.msk.f32.vlgmr.msra.gmra.mxu0 %vm692_vm4, %v4006_v12  ;;  %1825 = vrot.lane.b32.xlu0 %v1823_v23, %s3694_s29 }
 0x5e9   :  { %3216 = vmatprep.mubr.msk.f32.mxu0 %vm3692_vm0, %v3691_v1  ;;  %3221 = vmatprep.mubr.msk.f32.mxu1 %vm3692_vm0, %v3691_v1 }
 0x656   :  { %v1614_v24 = vpop.permute.xlu0 %1613 }
 0x657   :  { %3215 = vmatpush3.xpose.msk.msra.mxu0 %vm692_vm4, %v1614_v24 }
 0x658   :  { %3224 = vmatprep.subr.mxu0 %v3691_v1 }
 0x65a   :  { %v1826_v26 = vpop.permute.xlu0 %1825  ;;  %3217 = vmatmul.mubr.msk.f32.vlgmr.msra.gmra.mxu0 %vm692_vm4, %v4076_v9 }
 0x65b   :  { %3225 = vmatpush3.xpose.msk.msra.mxu0 %vm692_vm4, %v1833_v13  ;;  %v1828_v28 = vsel %vm692_vm4, %v1826_v26, 0.0  ;;  %3226 = vmatprep.mubr.msk.f32.mxu0 %vm3692_vm0, %v3691_v1  ;;  %v1127_v13 = vld [vmem:[%s4449_s18 + $0x38] sm:$0xff] }
 0x65c   :  { %1829 = vadd.xlane.f32.xlu1 %v1828_v28  ;;  %3234 = vmatprep.subr.mxu0 %v3691_v1 }
 0x65e   :  { %3227 = vmatmul.mubr.msk.f32.vlgmr.msra.gmra.mxu0 %vm692_vm4, %v1831_v25 }
 0x65f   :  { %3242 = vmatprep.mubr.msk.f32.mxu0 %vm3692_vm0, %v3691_v1  ;;  %3235 = vmatpush3.msra.mxu0 %v1127_v13 }
 0x660   :  { %3236 = vmatprep.subr.mxu0 %v3691_v1 }
 0x6a7   :  { %v1546_v27 = vpop.f32.mrf.mxu1 }
 0x6a8   :  { %v1472_v29 = vpop.f32.mrf.mxu0  ;;  %v1550_v30 = vmul.f32 0.17677669, %v1546_v27 }
 0x6a9   :  { %v1476_v31 = vmul.f32 0.17677669, %v1472_v29  ;;  %v3213_v33 = vpop.f32.mrf.mxu1 }
 0x6aa   :  { %v1552_v34 = vmul.f32 %v1550_v30, %v3965_v32  ;;  %v3208_v35 = vpop.f32.mrf.mxu0 }
 0x6ab   :  { %v1551_v36 = vmul.f32 %v1476_v31, %v3968_v38  ;;  %v2011_v31 = vrot.slane %v4078_v10, %v1817_v53  ;;  %v549_v10 = vadd.f32 %v3965_v32, %v3968_v38 }
 0x6ad   :  { %v4119_v39 = vadd.f32 %v1552_v34, %v1551_v36  ;;  %vm550_vm8 = vcmp.eq.f32.partialorder %v549_v10, 0.0 }
 0x6e5   :  { %v1830_v44 = vpop.xlane.xlu1 %1829 }
 0x71a   :  { %v1685_v40 = vpop.f32.mrf.mxu0 }
 0x71b   :  { %v1689_v18 = vmul.f32 0.17677669, %v1685_v40 }
 0x71c   :  { %v3218_v41 = vpop.f32.mrf.mxu0 }
 0x71d   :  { %v1766_v23 = vmul.f32 %v1689_v18, %v3968_v38 }
 0x71e   :  { %v1904_v42 = vpop.f32.mrf.mxu0 }
 0x71f   :  { %v1911_v43 = vrot.slane %v1904_v42, %v3998_v2 }
 0x720   :  { %v3228_v45 = vpop.f32.mrf.mxu0 }
 0x721   :  { %v1912_v46 = vadd.f32 %v1911_v43, %v1830_v44 }
 0x723   :  { %vm1913_vm7 = vcmp.ge.f32.partialorder %v1912_v46, 0.0  ;;  %v1914_v47 = vmul.f32 0.01, %v1912_v46 }
 0x725   :  { %v1915_v48 = vsel %vm1913_vm7, %v1912_v46, %v1914_v47 }
 0x726   :  { %v1916_v49 = vmul.f32 %v1915_v48, %v3888_v8  ;;  %v1917_v50 = vmul.f32 %v1915_v48, %v3881_v7 }
 0x728   :  { %v1918_v54 = vadd.f32 %v1917_v50, %v1916_v49 }
 0x72a   :  { %v1919_v55 = vsel %vm552_vm6, -1e+09, %v1918_v54 }
 0x72b   :  { %v1920_v56 = vsel %vm244_vm2, %v1919_v55, -inf }
 0x72c   :  { %1921 = vmax.xlane.f32.xlu0 %v1920_v56 }
 0x742   :  { %1601 = vrot.lane.b32.xlu0 %v4012_v19, %s3693_s28 }
 0x746   :  { %1932 = vrot.lane.b32.xlu0 %v3992_v61, %s3694_s29 }
 0x74a   :  { %2093 = vrot.lane.b32.xlu0 %v4008_v15, %s3695_s8 }
 0x74e   :  { %2288 = vrot.lane.b32.xlu0 %v4037_v51, %s3694_s29 }
 0x7b5   :  { %v1922_v7 = vpop.xlane.xlu0 %1921 }
 0x7b6   :  { %v1923_v8 = vsub.f32 %v1919_v55, %v1922_v7 }
 0x7b8   :  { %v1924_v57 = vmul.f32 1.442695, %v1923_v8 }
 0x7b9   :  { %v1602_v59 = vpop.permute.xlu0 %1601 }
 0x7ba   :  { %3355 = vpow2.f32 %v1924_v57  ;;  %v1604_v60 = vadd.f32 %v1602_v59, %v4082_v14 }
 0x7bd   :  { %v1933_v5 = vpop.permute.xlu0 %1932 }
 0x7c1   :  { %v2094_v29 = vpop.permute.xlu0 %2093 }
 0x7c5   :  { %v2289_v34 = vpop.permute.xlu0 %2288 }
 0x7c7   :  { %v3356_v37 = vpop.eup %3355 }
 0x7c8   :  { %v1926_v58 = vsel %vm244_vm2, %v3356_v37, 0.0 }
 0x7c9   :  { %1927 = vadd.xlane.f32.xlu1 %v1926_v58 }
 0x7da   :  { %1691 = vrot.lane.b32.xlu1 %v1604_v60, %s3695_s8 }
 0x7de   :  { %2085 = vrot.lane.b32.xlu1 %v4010_v17, %s3695_s8 }
 0x7e2   :  { %2101 = vrot.lane.b32.xlu1 %v4006_v12, %s3695_s8 }
 0x7e6   :  { %2293 = vrot.lane.b32.xlu1 %v4012_v19, %s3694_s29 }
 0x852   :  { %v1928_v61 = vpop.xlane.xlu1 %1927 }
 0x853   :  { %3357 = vrcp.f32 %v1928_v61 }
 0x856   :  { %v1692_v62 = vpop.permute.xlu1 %1691 }
 0x857   :  { %3220 = vmatpush3.xpose.msk.msra.mxu1 %vm692_vm4, %v1692_v62 }
 0x858   :  { %3229 = vmatprep.subr.mxu1 %v3691_v1 }
 0x85a   :  { %3222 = vmatmul.mubr.msk.f32.vlgmr.msra.gmra.mxu1 %vm692_vm4, %v4076_v9  ;;  %v1126_v9 = vld [vmem:[%s4449_s18 + $0x30] sm:$0xff]  ;;  %v2086_v27 = vpop.permute.xlu1 %2085 }
 0x85b   :  { %3230 = vmatpush3.msra.mxu1 %v1933_v5  ;;  %3231 = vmatprep.mubr.msk.f32.mxu1 %vm3692_vm0, %v3691_v1 }
 0x85c   :  { %3245 = vmatprep.subr.mxu1 %v3691_v1  ;;  %3237 = vmatpush3.msra.mxu0 %v1126_v9 }
 0x85d   :  { %3238 = vmatprep.subr.mxu0 %v3691_v1 }
 0x85e   :  { %3239 = vmatpush3.msra.mxu0 %v1125_v0  ;;  %v2102_v30 = vpop.permute.xlu1 %2101 }
 0x85f   :  { %3240 = vmatprep.subr.mxu0 %v3691_v1 }
 0x860   :  { %v3358_v6 = vpop.eup %3357  ;;  %3241 = vmatpush3.msra.mxu0 %v1124_v16 }
 0x861   :  { %v1930_v11 = vmul.f32 %v3358_v6, %v3356_v37  ;;  %3255 = vmatprep.subr.mxu0 %v3691_v1 }
 0x862   :  { %v2294_v36 = vpop.permute.xlu1 %2293 }
 0x863   :  { %3232 = vmatmul.mubr.msk.f32.vlgmr.msra.gmra.mxu1 %vm244_vm2, %v1930_v11  ;;  %v1554_v11 = vsel %vm550_vm8, -1e+09, %v4119_v39 }
 0x864   :  { %3247 = vmatprep.mubr.msk.f32.mxu1 %vm3692_vm0, %v3691_v1  ;;  %v1556_v13 = vsel %vm1555_vm9, %v1554_v11, -inf }
 0x91a   :  { %v1761_v20 = vpop.f32.mrf.mxu1 }
 0x91b   :  { %v1765_v21 = vmul.f32 0.17677669, %v1761_v20 }
 0x91c   :  { %v3223_v22 = vpop.f32.mrf.mxu1 }
 0x91d   :  { %v1767_v24 = vmul.f32 %v1765_v21, %v3965_v32 }
 0x91f   :  { %v1768_v25 = vadd.f32 %v1767_v24, %v1766_v23 }
 0x921   :  { %v1769_v44 = vsel %vm550_vm8, -1e+09, %v1768_v25 }
 0x922   :  { %v1770_v45 = vsel %vm1555_vm9, %v1769_v44, -inf }
 0x923   :  { %v4172_v26 = vpop.f32.mrf.mxu1 }
 0x924   :  { %3243 = vmatmul.mubr.msk.f32.vlgmr.msra.gmra.mxu0 %vm692_vm4, %v4172_v26 }
 0x925   :  { %v3233_v28 = vpop.f32.mrf.mxu1  ;;  %3257 = vmatprep.mubr.msk.f32.mxu0 %vm3692_vm0, %v3691_v1 }
 0x9e4   :  { %v2081_v33 = vpop.f32.mrf.mxu0 }
 0x9e5   :  { %v4181_v35 = vadd.f32 %v2081_v33, %v2011_v31 }
 0x9e6   :  { %v3244_v40 = vpop.f32.mrf.mxu0 }
 0x9e7   :  { %v2296_v41 = vadd.f32 %v2294_v36, %v4181_v35  ;;  %v2291_v42 = vadd.f32 %v2289_v34, %v4181_v35  ;;  %v2088_v43 = vadd.f32 %v2086_v27, %v4181_v35  ;;  %v2096_v53 = vadd.f32 %v2094_v29, %v4181_v35 }
 0x9e9   :  { %2379 = vrot.lane.b32.xlu1 %v2296_v41, %s3695_s8  ;;  %2301 = vrot.lane.b32.xlu0 %v2291_v42, %s3695_s8  ;;  %v544_v41 = vrot.slane %v3965_v32, %v3998_v2 }
 0x9ea   :  { %3246 = vmatpush3.xpose.msk.msra.mxu1 %vm692_vm4, %v2088_v43  ;;  %v4236_v43 = vsel %vm530_vm10, 1.0, %v3691_v1 }
 0x9eb   :  { %3250 = vmatprep.subr.mxu1 %v3691_v1  ;;  %v545_v10 = vmul.f32 %v4236_v43, %v544_v41 }
 0x9ed   :  { %3248 = vmatmul.mubr.msk.f32.vlgmr.msra.gmra.mxu1 %vm692_vm4, %v2102_v30  ;;  %2298 = vrot.lane.b32.xlu0 %v4041_v52, %s3693_s28  ;;  %v546_v3 = vsel %vm244_vm2, %v545_v10, 0.0 }
 0x9ee   :  { %3251 = vmatpush3.xpose.msk.msra.mxu1 %vm692_vm4, %v2096_v53  ;;  %3252 = vmatprep.mubr.msk.f32.mxu1 %vm3692_vm0, %v3691_v1 }
 0x9ef   :  { %3260 = vmatprep.subr.mxu1 %v3691_v1 }
 0x9f1   :  { %3253 = vmatmul.mubr.msk.f32.vlgmr.msra.gmra.mxu1 %vm692_vm4, %v2102_v30 }
 0x9f2   :  { %3262 = vmatprep.mubr.msk.f32.mxu1 %vm3692_vm0, %v3691_v1 }
 0xa0d   :  { %1771 = vmax.xlane.f32.xlu1 %v1770_v45 }
 0xa5b   :  { %v2380_v46 = vpop.permute.xlu1 %2379  ;;  %v2302_v47 = vpop.permute.xlu0 %2301 }
 0xa5c   :  { %3256 = vmatpush3.xpose.msk.msra.mxu0 %vm692_vm4, %v2302_v47  ;;  %3261 = vmatpush3.xpose.msk.msra.mxu1 %vm692_vm4, %v2380_v46 }
 0xa5d   :  { %3265 = vmatprep.subr.mxu0 %v3691_v1  ;;  %3276 = vmatprep.subr.mxu1 %v3691_v1 }
 0xa5f   :  { %v2299_v48 = vpop.permute.xlu0 %2298 }
 0xa60   :  { %3258 = vmatmul.mubr.msk.f32.vlgmr.msra.gmra.mxu0 %vm692_vm4, %v2299_v48  ;;  %3263 = vmatmul.mubr.msk.f32.vlgmr.msra.gmra.mxu1 %vm692_vm4, %v2299_v48 }
 0xa61   :  { %3273 = vmatprep.mubr.msk.f32.mxu0 %vm3692_vm0, %v3691_v1  ;;  %3284 = vmatprep.mubr.msk.f32.mxu1 %vm3692_vm0, %v3691_v1 }
 0xa96   :  { %v1772_v49 = vpop.xlane.xlu1 %1771 }
 0xa97   :  { %v1773_v50 = vsub.f32 %v1769_v44, %v1772_v49  ;;  %v536_v44 = vrot.slane %v3968_v38, %v3998_v2 }
 0xa99   :  { %v1774_v54 = vmul.f32 1.442695, %v1773_v50  ;;  %v537_v63 = vmul.f32 %v4236_v43, %v536_v44 }
 0xa9b   :  { %3359 = vpow2.f32 %v1774_v54  ;;  %v538_v47 = vsel %vm244_vm2, %v537_v63, 0.0 }
 0xaa8   :  { %v3360_v55 = vpop.eup %3359 }
 0xaa9   :  { %v1776_v56 = vsel %vm1555_vm9, %v3360_v55, 0.0 }
 0xaaa   :  { %1777 = vadd.xlane.f32.xlu1 %v1776_v56 }
 0xaad   :  { %v2174_v7 = vpop.f32.mrf.mxu1 }
 0xaae   :  { %v2178_v57 = vmul.f32 0.17677669, %v2174_v7 }
 0xaaf   :  { %v3249_v8 = vpop.f32.mrf.mxu1 }
 0xab0   :  { %v2253_v60 = vmul.f32 %v2178_v57, %v3968_v38 }
 0xab1   :  { %v2248_v37 = vpop.f32.mrf.mxu1 }
 0xab2   :  { %v2252_v58 = vmul.f32 0.17677669, %v2248_v37 }
 0xab3   :  { %v3254_v59 = vpop.f32.mrf.mxu1 }
 0xab4   :  { %v2254_v61 = vmul.f32 %v2252_v58, %v3965_v32 }
 0xab6   :  { %v2255_v62 = vadd.f32 %v2254_v61, %v2253_v60 }
 0xab8   :  { %v2256_v5 = vsel %vm550_vm8, -1e+09, %v2255_v62 }
 0xab9   :  { %v2257_v6 = vsel %vm1555_vm9, %v2256_v5, -inf }
 0xaba   :  { %2258 = vmax.xlane.f32.xlu0 %v2257_v6 }
 0xabe   :  { %1557 = vmax.xlane.f32.xlu0 %v1556_v13 }
 0xb20   :  { %v2373_v9 = vpop.f32.mrf.mxu0  ;;  %v2449_v0 = vpop.f32.mrf.mxu1 }
 0xb21   :  { %v2377_v16 = vmul.f32 0.17677669, %v2373_v9  ;;  %v2453_v18 = vmul.f32 0.17677669, %v2449_v0 }
 0xb22   :  { %v3259_v20 = vpop.f32.mrf.mxu0  ;;  %v3264_v21 = vpop.f32.mrf.mxu1 }
 0xb23   :  { %v2454_v22 = vmul.f32 %v2377_v16, %v3968_v38  ;;  %v2455_v23 = vmul.f32 %v2453_v18, %v3965_v32 }
 0xb25   :  { %v2456_v24 = vadd.f32 %v2455_v23, %v2454_v22 }
 0xb27   :  { %v2457_v25 = vsel %vm550_vm8, -1e+09, %v2456_v24 }
 0xb28   :  { %v2458_v28 = vsel %vm1555_vm9, %v2457_v25, -inf }
 0xb29   :  { %2459 = vmax.xlane.f32.xlu0 %v2458_v28 }
 0xb33   :  { %v1778_v39 = vpop.xlane.xlu1 %1777 }
 0xb34   :  { %3361 = vrcp.f32 %v1778_v39 }
 0xb41   :  { %v3362_v27 = vpop.eup %3361 }
 0xb42   :  { %v1780_v29 = vmul.f32 %v3362_v27, %v3360_v55 }
 0xb43   :  { %v2259_v30 = vpop.xlane.xlu0 %2258 }
 0xb44   :  { %v2260_v31 = vsub.f32 %v2256_v5, %v2259_v30  ;;  %1814 = vst.msk [vmem:[%s4455_s24 + $0x1] sm:$0x1] %vm1555_vm9, %v1780_v29  ;;  %v1784_v32 = vrot.slane %v1780_v29, %v3998_v2 }
 0xb46   :  { %v2261_v33 = vmul.f32 1.442695, %v2260_v31  ;;  %v1785_v48 = vmul.f32 %v4236_v43, %v1784_v32  ;;  %v1581_v32 = vrot.slane %v4006_v12, %v3998_v2 }
 0xb47   :  { %v1558_v34 = vpop.xlane.xlu0 %1557 }
 0xb48   :  { %3363 = vpow2.f32 %v2261_v33  ;;  %v1559_v36 = vsub.f32 %v1554_v11, %v1558_v34  ;;  %v1786_v49 = vsel %vm244_vm2, %v1785_v48, 0.0  ;;  %v2506_v34 = vld [vmem:[%s4451_s20 + $0x38] sm:$0xff] }
 0xb49   :  { %3266 = vmatpush3.msra.mxu0 %v2506_v34 }
 0xb4a   :  { %v1560_v40 = vmul.f32 1.442695, %v1559_v36  ;;  %v2502_v36 = vld [vmem:[%s4451_s20 + $0x18] sm:$0xff]  ;;  %3267 = vmatprep.subr.mxu0 %v3691_v1 }
 0xb4b   :  { %3277 = vmatpush3.msra.mxu1 %v2502_v36 }
 0xb4c   :  { %3365 = vpow2.f32 %v1560_v40  ;;  %v2505_v40 = vld [vmem:[%s4451_s20 + $0x30] sm:$0xff]  ;;  %3278 = vmatprep.subr.mxu1 %v3691_v1 }
 0xb4d   :  { %3268 = vmatpush3.msra.mxu0 %v2505_v40 }
 0xb4e   :  { %3269 = vmatprep.subr.mxu0 %v3691_v1 }
 0xb55   :  { %v3364_v42 = vpop.eup %3363 }
 0xb56   :  { %v2263_v53 = vsel %vm1555_vm9, %v3364_v42, 0.0 }
 0xb57   :  { %2264 = vadd.xlane.f32.xlu0 %v2263_v53 }
 0xb59   :  { %v3366_v45 = vpop.eup %3365 }
 0xb5a   :  { %v1562_v46 = vsel %vm1555_vm9, %v3366_v45, 0.0 }
 0xb5b   :  { %1563 = vadd.xlane.f32.xlu1 %v1562_v46  ;;  %547 = vadd.xlane.f32.xlu0 %v546_v3 }
 0xb5f   :  { %539 = vadd.xlane.f32.xlu1 %v538_v47 }
 0xb63   :  { %1787 = vadd.xlane.f32.xlu1 %v1786_v49 }
 0xb74   :  { %1596 = vrot.lane.b32.xlu1 %v4037_v51, %s3695_s8 }
 0xb78   :  { %2089 = vrot.lane.b32.xlu1 %v4010_v17, %s3694_s29 }
 0xb7c   :  { %2097 = vrot.lane.b32.xlu1 %v4008_v15, %s3694_s29 }
 0xbb2   :  { %v2460_v38 = vpop.xlane.xlu0 %2459 }
 0xbb3   :  { %v2461_v50 = vsub.f32 %v2457_v25, %v2460_v38 }
 0xbb5   :  { %v2462_v54 = vmul.f32 1.442695, %v2461_v50 }
 0xbb7   :  { %3367 = vpow2.f32 %v2462_v54 }
 0xbc4   :  { %v3368_v55 = vpop.eup %3367 }
 0xbc5   :  { %v2464_v56 = vsel %vm1555_vm9, %v3368_v55, 0.0 }
 0xbc6   :  { %2465 = vadd.xlane.f32.xlu0 %v2464_v56 }
 0xbdc   :  { %1605 = vrot.lane.b32.xlu0 %v4012_v19, %s3695_s8 }
 0xbe0   :  { %v2265_v7 = vpop.xlane.xlu0 %2264 }
 0xbe1   :  { %3369 = vrcp.f32 %v2265_v7 }
 0xbe4   :  { %v1564_v8 = vpop.xlane.xlu1 %1563  ;;  %v4278_v0 = vpop.xlane.xlu0 %547 }
 0xbe5   :  { %3371 = vrcp.f32 %v1564_v8 }
 0xbe8   :  { %v4276_v13 = vpop.xlane.xlu1 %539 }
 0xbec   :  { %v1788_v9 = vpop.xlane.xlu1 %1787 }
 0xbed   :  { %v1789_v22 = vmul.f32 %v1788_v9, %v4276_v13  ;;  %v1790_v23 = vmul.f32 %v1788_v9, %v4278_v0 }
 0xbee   :  { %v3370_v57 = vpop.eup %3369 }
 0xbef   :  { %v2267_v37 = vmul.f32 %v3370_v57, %v3364_v42  ;;  %v2501_v42 = vld [vmem:[%s4451_s20 + $0x10] sm:$0xff] }
 0xbf0   :  { %v1597_v16 = vpop.permute.xlu1 %1596  ;;  %3279 = vmatpush3.msra.mxu1 %v2501_v42 }
 0xbf1   :  { %2497 = vst.msk [vmem:[%s4455_s24 + $0x2] sm:$0x1] %vm1555_vm9, %v2267_v37  ;;  %v2271_v59 = vrot.slane %v2267_v37, %v3998_v2  ;;  %v1599_v20 = vadd.f32 %v1597_v16, %v4082_v14  ;;  %3280 = vmatprep.subr.mxu1 %v3691_v1  ;;  %v2504_v37 = vld [vmem:[%s4451_s20 + $0x28] sm:$0xff]  ;;  %v2292_v16 = vadd.f32 %v4181_v35, %v4037_v51 }
 0xbf2   :  { %v3372_v58 = vpop.eup %3371  ;;  %3270 = vmatpush3.msra.mxu0 %v2504_v37 }
 0xbf3   :  { %v1566_v60 = vmul.f32 %v3372_v58, %v3366_v45  ;;  %v2272_v62 = vmul.f32 %v4236_v43, %v2271_v59  ;;  %v1797_v24 = vmul.f32 %v1789_v22, %v1599_v20  ;;  %v2500_v58 = vld [vmem:[%s4451_s20 + $0x8] sm:$0xff]  ;;  %v2499_v59 = vld [vmem:[%s4451_s20] sm:$0xff]  ;;  %3271 = vmatprep.subr.mxu0 %v3691_v1 }
 0xbf4   :  { %v2090_v31 = vpop.permute.xlu1 %2089  ;;  %3281 = vmatpush3.msra.mxu1 %v2500_v58 }
 0xbf5   :  { %v1570_v61 = vrot.slane %v1566_v60, %v3998_v2  ;;  %1813 = vst.msk [vmem:[%s4455_s24] sm:$0x1] %vm1555_vm9, %v1566_v60  ;;  %v2273_v11 = vsel %vm244_vm2, %v2272_v62, 0.0  ;;  %3282 = vmatprep.subr.mxu1 %v3691_v1  ;;  %v1791_v60 = vadd.f32 %v1790_v23, %v1789_v22  ;;  %v1795_v62 = vrot.slane %v4041_v52, %v3998_v2 }
 0xbf6   :  { %3283 = vmatpush3.msra.mxu1 %v2499_v59 }
 0xbf7   :  { %v1571_v5 = vmul.f32 %v4236_v43, %v1570_v61  ;;  %v3379_v61 = vld [vmem:[%s4472_s16] sm:$0xff]  ;;  %3298 = vmatprep.subr.mxu1 %v3691_v1 }
 0xbf8   :  { %v2098_v33 = vpop.permute.xlu1 %2097  ;;  %3285 = vmatmul.mubr.msk.f32.vlgmr.msra.gmra.mxu1 %vm692_vm4, %v3379_v61 }
 0xbf9   :  { %v1572_v6 = vsel %vm244_vm2, %v1571_v5, 0.0  ;;  %v2100_v45 = vadd.f32 %v2098_v33, %v4181_v35  ;;  %3322 = vmatprep.mubr.msk.f32.mxu1 %vm3692_vm0, %v3691_v1  ;;  %v1796_v5 = vmul.f32 %v1795_v62, %v1791_v60  ;;  %v2485_v33 = vadd.f32 %v3379_v61, %v4172_v26 }
 0xbfa   :  { %1573 = vadd.xlane.f32.xlu1 %v1572_v6 }
 0xbfb   :  { %2274 = vadd.xlane.f32.xlu0 %v2273_v11 }
 0xc0b   :  { %1396 = vrot.lane.b32.xlu1 %v4008_v15, %s3693_s28 }
 0xc11   :  { %1390 = vrot.lane.b32.xlu0 %v4010_v17, %s3693_s28 }
 0xc4f   :  { %v2466_v18 = vpop.xlane.xlu0 %2465 }
 0xc50   :  { %3373 = vrcp.f32 %v2466_v18  ;;  %v2297_v18 = vadd.f32 %v4181_v35, %v4012_v19  ;;  %v1805_v19 = vadd.f32 %v3379_v61, %v4070_v4  ;;  %v2651_v4 = vld [vmem:[%s4451_s20 + $0x48] sm:$0xff] }
 0xc53   :  { %v1606_v21 = vpop.permute.xlu0 %1605 }
 0xc54   :  { %v1608_v15 = vadd.f32 %v1606_v21, %v4082_v14 }
 0xc56   :  { %v1798_v25 = vmul.f32 %v1790_v23, %v1608_v15 }
 0xc58   :  { %v1799_v17 = vadd.f32 %v1798_v25, %v1797_v24 }
 0xc5a   :  { %1801 = vrot.lane.b32.xlu1 %v1799_v17, %s3695_s8 }
 0xc5d   :  { %v3374_v28 = vpop.eup %3373 }
 0xc5e   :  { %v2468_v39 = vmul.f32 %v3374_v28, %v3368_v55 }
 0xc60   :  { %v2472_v27 = vrot.slane %v2468_v39, %v3998_v2  ;;  %2498 = vst.msk [vmem:[%s4455_s24 + $0x3] sm:$0x1] %vm1555_vm9, %v2468_v39 }
 0xc62   :  { %v2473_v29 = vmul.f32 %v4236_v43, %v2472_v27  ;;  %v2092_v43 = vadd.f32 %v2090_v31, %v4181_v35  ;;  %v2650_v31 = vld [vmem:[%s4451_s20 + $0x40] sm:$0xff] }
 0xc64   :  { %v2474_v30 = vsel %vm244_vm2, %v2473_v29, 0.0  ;;  %v2653_v29 = vld [vmem:[%s4451_s20 + $0x58] sm:$0xff] }
 0xc65   :  { %2475 = vadd.xlane.f32.xlu0 %v2474_v30  ;;  %v2652_v30 = vld [vmem:[%s4451_s20 + $0x50] sm:$0xff] }
 0xc83   :  { %v1574_v41 = vpop.xlane.xlu1 %1573 }
 0xc84   :  { %v1575_v53 = vmul.f32 %v1574_v41, %v4276_v13  ;;  %v1576_v10 = vmul.f32 %v1574_v41, %v4278_v0  ;;  %v2275_v44 = vpop.xlane.xlu0 %2274 }
 0xc85   :  { %v2276_v46 = vmul.f32 %v2275_v44, %v4276_v13  ;;  %v2277_v3 = vmul.f32 %v2275_v44, %v4278_v0  ;;  %v2738_v44 = vld [vmem:[%s4452_s21 + $0x48] sm:$0xff] }
 0xc86   :  { %v1577_v63 = vadd.f32 %v1576_v10, %v1575_v53 }
 0xc87   :  { %v2278_v47 = vadd.f32 %v2277_v3, %v2276_v46  ;;  %v2280_v48 = vmul.f32 %v2276_v46, %v2092_v43  ;;  %v2281_v49 = vmul.f32 %v2277_v3, %v2100_v45  ;;  %v1397_v38 = vpop.permute.xlu1 %1396  ;;  %v2737_v45 = vld [vmem:[%s4452_s21 + $0x40] sm:$0xff]  ;;  %v2736_v46 = vld [vmem:[%s4452_s21 + $0x38] sm:$0xff]  ;;  %v2735_v3 = vld [vmem:[%s4452_s21 + $0x30] sm:$0xff] }
 0xc88   :  { %v1399_v50 = vadd.f32 %v1397_v38, %v4082_v14  ;;  %v1391_v54 = vpop.permute.xlu0 %1390  ;;  %v1582_v55 = vmul.f32 %v1581_v32, %v1577_v63  ;;  %v2734_v63 = vld [vmem:[%s4452_s21 + $0x28] sm:$0xff]  ;;  %v2729_v38 = vld [vmem:[%s4452_s21] sm:$0xff] }
 0xc89   :  { %v1393_v56 = vadd.f32 %v1391_v54, %v4082_v14  ;;  %v2282_v7 = vadd.f32 %v2281_v49, %v2280_v48  ;;  %v2503_v14 = vld [vmem:[%s4451_s20 + $0x20] sm:$0xff]  ;;  %v2279_v25 = vmul.f32 %v2278_v47, %v1581_v32  ;;  %v2732_v47 = vld [vmem:[%s4452_s21 + $0x18] sm:$0xff]  ;;  %v2731_v48 = vld [vmem:[%s4452_s21 + $0x10] sm:$0xff]  ;;  %s3644_s20 = scalar_lea.vmem %s2909_s5, 32 }
 0xc8a   :  { %v1584_v8 = vmul.f32 %v1576_v10, %v1399_v50  ;;  %3272 = vmatpush3.msra.mxu0 %v2503_v14  ;;  %v2739_v10 = vld [vmem:[%s4452_s21 + $0x50] sm:$0xff]  ;;  %v2733_v32 = vld [vmem:[%s4452_s21 + $0x20] sm:$0xff]  ;;  %v2730_v49 = vld [vmem:[%s4452_s21 + $0x8] sm:$0xff]  ;;  %p3646_p11 = scmp.lt.s32.totalorder %s3644_s20, %s3640_s10 }
 0xc8b   :  { %v1583_v57 = vmul.f32 %v1575_v53, %v1393_v56  ;;  %2284 = vrot.lane.b32.xlu0 %v2282_v7, %s3693_s28  ;;  %3287 = vmatprep.subr.mxu0 %v3691_v1  ;;  %v2740_v53 = vld [vmem:[%s4452_s21 + $0x58] sm:$0xff] }
 0xc8c   :  { %3299 = vmatpush3.msra.mxu1 %v2740_v53  ;;  %v2816_v14 = vld [vmem:[#allocation24] sm:$0x1]  ;;  %p3647_p12 = por %p3646_p11, %p3645_p10 }
 0xc8d   :  { %v1585_v12 = vadd.f32 %v1584_v8, %v1583_v57  ;;  %3300 = vmatprep.subr.mxu1 %v3691_v1 }
 0xc8e   :  { %3301 = vmatpush3.msra.mxu1 %v2739_v10  ;;  %p3648_p13 = pnand %p3647_p12, %p3641_p9 }
 0xc8f   :  { %1587 = vrot.lane.b32.xlu1 %v1585_v12, %s3694_s29  ;;  %3302 = vmatprep.subr.mxu1 %v3691_v1 }
 0xc90   :  { %3303 = vmatpush3.msra.mxu1 %v2738_v44 }
 0xc91   :  { %3304 = vmatprep.subr.mxu1 %v3691_v1 }
 0xc92   :  { %3305 = vmatpush3.msra.mxu1 %v2737_v45 }
 0xc93   :  { %3306 = vmatprep.subr.mxu1 %v3691_v1 }
 0xc94   :  { %3307 = vmatpush3.msra.mxu1 %v2736_v46 }
 0xc95   :  { %3308 = vmatprep.subr.mxu1 %v3691_v1 }
 0xc96   :  { %3309 = vmatpush3.msra.mxu1 %v2735_v3 }
 0xc97   :  { %3310 = vmatprep.subr.mxu1 %v3691_v1 }
 0xc98   :  { %3311 = vmatpush3.msra.mxu1 %v2734_v63 }
 0xc99   :  { %3312 = vmatprep.subr.mxu1 %v3691_v1 }
 0xc9a   :  { %3313 = vmatpush3.msra.mxu1 %v2733_v32 }
 0xc9b   :  { %3314 = vmatprep.subr.mxu1 %v3691_v1 }
 0xc9c   :  { %3315 = vmatpush3.msra.mxu1 %v2732_v47 }
 0xc9d   :  { %3316 = vmatprep.subr.mxu1 %v3691_v1 }
 0xc9e   :  { %3317 = vmatpush3.msra.mxu1 %v2731_v48 }
 0xc9f   :  { %3318 = vmatprep.subr.mxu1 %v3691_v1 }
 0xca0   :  { %3319 = vmatpush3.msra.mxu1 %v2730_v49 }
 0xca1   :  { %3320 = vmatprep.subr.mxu1 %v3691_v1 }
 0xca2   :  { %3321 = vmatpush3.msra.mxu1 %v2729_v38 }
 0xcb8   :  { %v2646_v43 = vpop.f32.mrf.mxu1 }
 0xcba   :  { %v3286_v26 = vpop.f32.mrf.mxu1 }
 0xccc   :  { %v1802_v6 = vpop.permute.xlu1 %1801 }
 0xccd   :  { %v1804_v11 = vadd.f32 %v1802_v6, %v1796_v5 }
 0xccf   :  { %1808 = vrot.lane.b32.xlu0 %v1804_v11, %s3694_s29 }
 0xcee   :  { %v2476_v9 = vpop.xlane.xlu0 %2475 }
 0xcef   :  { %v2477_v20 = vmul.f32 %v2476_v9, %v4276_v13  ;;  %v2478_v21 = vmul.f32 %v2476_v9, %v4278_v0 }
 0xcf1   :  { %v2479_v22 = vadd.f32 %v2478_v21, %v2477_v20  ;;  %v2481_v23 = vmul.f32 %v2477_v20, %v2292_v16  ;;  %v2482_v15 = vmul.f32 %v2478_v21, %v2297_v18 }
 0xcf3   :  { %v2480_v2 = vmul.f32 %v2479_v22, %v1795_v62  ;;  %v2483_v52 = vadd.f32 %v2482_v15, %v2481_v23 }
 0xcf5   :  { %v2484_v24 = vadd.f32 %v2483_v52, %v2480_v2 }
 0xcf7   :  { %2492 = vrot.lane.b32.xlu0 %v2484_v24, %s3693_s28 }
 0xcfd   :  { %v2285_v17 = vpop.permute.xlu0 %2284 }
 0xcfe   :  { %v2287_v28 = vadd.f32 %v2285_v17, %v2279_v25 }
 0xd00   :  { %2487 = vrot.lane.b32.xlu1 %v2287_v28, %s3695_s8  ;;  %s4476_s8 = sld [smem:[#allocation40_spill]] }
 0xd01   :  { %v1588_v51 = vpop.permute.xlu1 %1587 }
 0xd02   :  { %v1590_v35 = vadd.f32 %v1588_v51, %v1582_v55 }
 0xd04   :  { %v1806_v13 = vadd.f32 %v1805_v19, %v1590_v35 }
 0xd06   :  { %v2899_v5 = vld [vmem:[%s4476_s8] sm:$0x1] }
 0xd41   :  { %v1809_v39 = vpop.permute.xlu0 %1808 }
 0xd42   :  { %v1811_v0 = vadd.f32 %v1809_v39, %v1806_v13 }
 0xd44   :  { %v1812_v27 = vmax.f32 %v1811_v0, 0.0 }
 0xd46   :  { %3274 = vmatmul.mubr.msk.f32.vlgmr.msra.gmra.mxu0 %vm692_vm4, %v1812_v27 }
 0xd47   :  { %3288 = vmatpush3.msra.mxu0 %v2653_v29  ;;  %3295 = vmatprep.mubr.msk.f32.mxu0 %vm3692_vm0, %v3691_v1 }
 0xd48   :  { %3289 = vmatprep.subr.mxu0 %v3691_v1 }
 0xd49   :  { %3290 = vmatpush3.msra.mxu0 %v2652_v30 }
 0xd4a   :  { %3291 = vmatprep.subr.mxu0 %v3691_v1 }
 0xd4b   :  { %3292 = vmatpush3.msra.mxu0 %v2651_v4 }
 0xd4c   :  { %3293 = vmatprep.subr.mxu0 %v3691_v1 }
 0xd4d   :  { %3294 = vmatpush3.msra.mxu0 %v2650_v31 }
 0xd4e   :  { %3325 = vmatprep.subr.mxu0 %v3691_v1 }
 0xd69   :  { %v2493_v40 = vpop.permute.xlu0 %2492 }
 0xd72   :  { %v2488_v34 = vpop.permute.xlu1 %2487 }
 0xd73   :  { %v2490_v36 = vadd.f32 %v2488_v34, %v2485_v33 }
 0xd75   :  { %v2495_v41 = vadd.f32 %v2493_v40, %v2490_v36 }
 0xd77   :  { %v2496_v42 = vmax.f32 %v2495_v41, 0.0 }
 0xd79   :  { %3296 = vmatmul.mubr.msk.f32.vlgmr.msra.gmra.mxu0 %vm692_vm4, %v2496_v42 }
 0xd7a   :  { %3327 = vmatprep.mubr.msk.f32.mxu0 %vm3692_vm0, %v3691_v1 }
 0xe06   :  { %v2576_v50 = vpop.f32.mrf.mxu0 }
 0xe07   :  { %v2647_v55 = vadd.f32 %v2646_v43, %v2576_v50 }
 0xe08   :  { %v3275_v54 = vpop.f32.mrf.mxu0 }
 0xe39   :  { %v2723_v56 = vpop.f32.mrf.mxu0 }
 0xe3a   :  { %v2727_v7 = vadd.f32 %v2723_v56, %v2647_v55 }
 0xe3b   :  { %v3297_v8 = vpop.f32.mrf.mxu0 }
 0xe3c   :  { %v2728_v57 = vmax.f32 %v2727_v7, 0.0 }
 0xe3e   :  { %3323 = vmatmul.mubr.msk.f32.vlgmr.msra.gmra.mxu1 %vm2741_vm11, %v2728_v57 }
 0xefe   :  { %v2811_v12 = vpop.f32.mrf.mxu1 }
 0xeff   :  { %v2815_v37 = vmax.f32 %v2811_v12, 0.0 }
 0xf00   :  { %v3324_v58 = vpop.f32.mrf.mxu1 }
 0xf01   :  { %3326 = vmatpush3.xpose.msk.msra.mxu0 %vm2741_vm11, %v2815_v37 }
 0xf04   :  { %3328 = vmatmul.mubr.msk.f32.vlgmr.msra.gmra.mxu0 %vm2741_vm11, %v2816_v14 }
 0xfc4   :  { %v2889_v59 = vpop.f32.mrf.mxu0 }
 0xfc5   :  { %v2982_v60 = vmul.f32 -1.442695, %v2889_v59 }
 0xfc6   :  { %v3329_v61 = vpop.f32.mrf.mxu0 }
 0xfc7   :  { %3375 = vpow2.f32 %v2982_v60 }
 0xfd4   :  { %v3376_v1 = vpop.eup %3375 }
 0xfd5   :  { %v2896_v62 = vadd.f32 1.0, %v3376_v1 }
 0xfd7   :  { %3377 = vrcp.f32 %v2896_v62 }
 0xfe4   :  { %v3378_v6 = vpop.eup %3377 }
 0xfe5   :  { %v2900_v11 = vmul.f32 %v3378_v6, %v2899_v5 }
 0xfe7   :  { %2901 = vst.msk [vmem:[#allocation25] sm:$0x1] %vm1555_vm9, %v2900_v11 }
 0xfe8   :  { %3651 = shalt.err (!%p3648_p13)
}
 0xfe9   :  { %2911 = dma.vmem_to_hbm [thread:$0]  %s2909_s5, 16, %s4454_s23, [#allocation6]  }
 0xfea   :  { %3674 = dma.done.wait [#allocation6], 16  }
 0xfeb   :  { %3675 = vsyncadd [#allocation6], 4294967280 }
 0xfec   :  { %2919 = vsyncpa [#allocation5], 1 }
 0xfed   :  { %2920 = vsyncpa [#allocation8], 1 }
 0xfee   :  { %2921 = vsyncpa [#allocation11], 1 }
 0xfef   :  { %2922 = vsyncpa [#allocation14], 1 }
 0xff0   :  { %2923 = vsyncpa [#allocation17], 1 }
 0xff1   :  { %2924 = vsyncpa [#allocation20], 1 }
 0xff2   :  { %2925 = vsyncpa [#allocation23], 1 }
 0xff3   :  { %2926 = vsyncpa [#allocation6], 1 }

</bundles_post_ra>
